<compile_context>
chip_gen: v5e
topology: v5e:2x2
jax: 0.10.0
libtpu: 0.0.40
codegen_flags: <defaults>
</compile_context>

<pallas_src>
import functools

import jax
import jax.numpy as jnp
import numpy as np
from jax import lax
from jax.experimental import pallas as pl
from jax.experimental.pallas import tpu as pltpu

EPS = 1e-5          # nn.InstanceNorm2d default eps
NEG_SLOPE = 0.1     # nn.LeakyReLU(0.1)

# Tap order: (oy, ox) row-major, matching the (dy, dx, ci) weight flattening.
_TAPS = [(-1, -1), (-1, 0), (-1, 1),
         (0, -1), (0, 0), (0, 1),
         (1, -1), (1, 0), (1, 1)]


def _round_up(x, m):
    return (x + m - 1) // m * m


# --------------------------------------------------------------------------
# Kernel
# --------------------------------------------------------------------------
def _stage(xf, masks_ref, w_mat, gb, patches_ref, *, C, Cout, W, HW, B_blk):
    """One fused conv3x3 + InstanceNorm + LeakyReLU stage on B_blk images.

    xf:          (C, B_blk*HW) f32 value, C a multiple of 8, lane-dense.
    masks_ref:   VMEM ref (9, Cmax, B_blk*HW), per-tap boundary masks,
                 already broadcast over channels and tiled per image.
    w_mat:       (Cout, 9*C) f32, column order (dy, dx, ci).
    gb:          (Cout, 2) f32, [:, 0] = gamma, [:, 1] = beta.
    patches_ref: VMEM scratch (>= 9*C, B_blk*HW) f32 -- im2col staging.
    Returns a list of B_blk per-image (Cout, HW) activations.
    """
    HWb = B_blk * HW

    # im2col: write each rolled+masked tap into aligned 8-row scratch blocks.
    for k, (oy, ox) in enumerate(_TAPS):
        s = oy * W + ox                                    # flat spatial shift
        t = xf if s == 0 else pltpu.roll(xf, (-s) % HWb, axis=1)
        if s != 0:
            m = masks_ref[k]                               # (Cmax, HWb)
            if m.shape[0] != C:
                m = m[:C]
            t = t * m                                      # zero out-of-image taps
        patches_ref[k * C:(k + 1) * C, :] = t

    # Single MXU matmul (K = 9*C, N = B_blk*HW), f32 accumulation.
    acc = jnp.dot(w_mat, patches_ref[:9 * C, :],
                  preferred_element_type=jnp.float32)      # (Cout, HWb)

    gamma = gb[:, 0:1]                                     # (Cout, 1)
    beta = gb[:, 1:2]
    inv_hw = 1.0 / HW

    ys = []
    for b in range(B_blk):
        a = acc[:, b * HW:(b + 1) * HW]                    # (Cout, HW), 128-aligned
        # One cross-lane reduction for both mean and E[x^2].
        red = jnp.sum(jnp.concatenate([a, a * a], axis=0),
                      axis=1, keepdims=True)               # (2*Cout, 1)
        mean = red[:Cout] * inv_hw
        var = red[Cout:] * inv_hw - mean * mean            # biased, as in torch
        scale = gamma * lax.rsqrt(var + EPS)
        shift = beta - mean * scale
        y = a * scale + shift                              # fused IN + affine
        ys.append(jnp.maximum(y, NEG_SLOPE * y))           # LeakyReLU(0.1)
    return ys


def _fused_kernel(x_ref, masks_ref, w1_ref, gb1_ref, w2_ref, gb2_ref, o_ref,
                  patches_ref, *, Cin, Cin_p, mid_p, W, HW, B_blk):
    HWb = B_blk * HW

    # Assemble (Cin_p, B_blk*HW): lane-concat the B_blk images, zero-pad chans.
    imgs = [x_ref[b] for b in range(B_blk)]                # each (Cin, HW)
    xf = imgs[0] if B_blk == 1 else jnp.concatenate(imgs, axis=1)
    if Cin_p > Cin:
        xf = jnp.concatenate(
            [xf, jnp.zeros((Cin_p - Cin, HWb), xf.dtype)], axis=0)

    # Stage 1: Cin_p -> mid_p
    h_imgs = _stage(xf, masks_ref, w1_ref[...], gb1_ref[...], patches_ref,
                    C=Cin_p, Cout=mid_p, W=W, HW=HW, B_blk=B_blk)
    hf = h_imgs[0] if B_blk == 1 else jnp.concatenate(h_imgs, axis=1)

    # Stage 2: mid_p -> out (scratch reused)
    out_ch = o_ref.shape[1]
    y_imgs = _stage(hf, masks_ref, w2_ref[...], gb2_ref[...], patches_ref,
                    C=mid_p, Cout=out_ch, W=W, HW=HW, B_blk=B_blk)

    for b in range(B_blk):
        o_ref[b] = y_imgs[b].astype(o_ref.dtype)


# --------------------------------------------------------------------------
# Packing (done once, outside the per-call jit)
# --------------------------------------------------------------------------
def _tap_masks(H, W, B_blk, C_bcast):
    """Static (9, C_bcast, B_blk*H*W) masks: 1 where the tap is in-image."""
    ys, xs = np.meshgrid(np.arange(H), np.arange(W), indexing="ij")
    ys = ys.reshape(-1)
    xs = xs.reshape(-1)
    rows = []
    for oy, ox in _TAPS:
        ok = ((ys + oy >= 0) & (ys + oy < H) & (xs + ox >= 0) & (xs + ox < W))
        rows.append(ok.astype(np.float32))
    m = np.stack(rows, axis=0)                       # (9, HW)
    m = np.tile(m, (1, B_blk))                       # (9, B_blk*HW)
    m = np.broadcast_to(m[:, None, :], (9, C_bcast, B_blk * H * W)).copy()
    return jnp.asarray(m)


def _target_grid_steps():
    """v7x has 2 TensorCores per chip -> keep >= 2 parallel grid steps there."""
    try:
        kind = jax.devices()[0].device_kind.lower()
    except Exception:
        return 1
    return 2 if "v7" in kind else 1


def _pick_b_blk(N, HW):
    """Largest images-per-step that divides N, fits a lane budget, and keeps
    at least the target number of grid steps (for multi-TC chips)."""
    target = min(N, max(1, _target_grid_steps()))
    cap = max(1, min(N, 4096 // HW))
    best = 1
    for b in range(1, cap + 1):
        if N % b == 0 and (N // b) >= target:
            best = b
    return best


def pack_params(params, N, H, W):
    """Pre-pack weights / affine params / masks for the fused kernel."""
    mid, Cin = params["w1"].shape[:2]
    out = params["w2"].shape[0]
    HW = H * W
    B_blk = _pick_b_blk(N, HW)
    Cin_p = _round_up(Cin, 8)
    mid_p = _round_up(mid, 8)
    Cmax = max(Cin_p, mid_p)

    def pack_w(w, cout_p, cin_p):
        cout, cin = w.shape[:2]
        wp = np.zeros((cout_p, cin_p, 3, 3), np.float32)
        wp[:cout, :cin] = np.asarray(w, np.float32)
        # (Cout_p, Cin_p, 3, 3) -> (Cout_p, 3, 3, Cin_p) -> (Cout_p, 9*Cin_p)
        return jnp.asarray(wp.transpose(0, 2, 3, 1).reshape(cout_p, 9 * cin_p))

    w1m = pack_w(params["w1"], mid_p, Cin_p)          # (mid_p, 9*Cin_p)
    w2m = pack_w(params["w2"], out, mid_p)            # (out,   9*mid_p)

    gb1 = np.zeros((mid_p, 2), np.float32)
    gb1[:, 0] = 1.0                                   # pad channels: gamma=1, beta=0
    gb1[:mid, 0] = np.asarray(params["g1"], np.float32)
    gb1[:mid, 1] = np.asarray(params["beta1"], np.float32)
    gb2 = np.stack([np.asarray(params["g2"], np.float32),
                    np.asarray(params["beta2"], np.float32)], axis=1)

    masks = _tap_masks(H, W, B_blk, Cmax)             # (9, Cmax, B_blk*HW)

    # Conv biases b1/b2 are exactly cancelled by InstanceNorm's mean
    # subtraction, so they are not packed / passed to the kernel.
    return {"w1m": w1m, "gb1": jnp.asarray(gb1),
            "w2m": w2m, "gb2": jnp.asarray(gb2), "masks": masks}


# --------------------------------------------------------------------------
# Forward
# --------------------------------------------------------------------------
@jax.jit
def conv_block_2d(x_nchw, packed):
    """ConvBlock2d forward. Input/output are NCHW to match the PyTorch module."""
    N, Cin, H, W = x_nchw.shape
    HW = H * W

    w1m, gb1 = packed["w1m"], packed["gb1"]
    w2m, gb2 = packed["w2m"], packed["gb2"]
    masks = packed["masks"]

    mid_p = w1m.shape[0]
    Cin_p = w1m.shape[1] // 9
    out = w2m.shape[0]
    Cmax = masks.shape[1]
    B_blk = masks.shape[2] // HW
    steps = N // B_blk
    assert steps * B_blk == N, "packed params were built for a different N"

    xf = x_nchw.reshape(N, Cin, HW)                    # free view (channels-first)

    kernel = functools.partial(_fused_kernel, Cin=Cin, Cin_p=Cin_p,
                               mid_p=mid_p, W=W, HW=HW, B_blk=B_blk)

    yf = pl.pallas_call(
        kernel,
        out_shape=jax.ShapeDtypeStruct((N, out, HW), jnp.float32),
        grid_spec=pltpu.PrefetchScalarGridSpec(
            num_scalar_prefetch=0,
            grid=(steps,),
            in_specs=[
                pl.BlockSpec((B_blk, Cin, HW), lambda g: (g, 0, 0)),
                pl.BlockSpec((9, Cmax, B_blk * HW), lambda g: (0, 0, 0)),
                pl.BlockSpec((mid_p, 9 * Cin_p), lambda g: (0, 0)),
                pl.BlockSpec((mid_p, 2), lambda g: (0, 0)),
                pl.BlockSpec((out, 9 * mid_p), lambda g: (0, 0)),
                pl.BlockSpec((out, 2), lambda g: (0, 0)),
            ],
            out_specs=pl.BlockSpec((B_blk, out, HW), lambda g: (g, 0, 0)),
            scratch_shapes=[pltpu.VMEM((9 * Cmax, B_blk * HW), jnp.float32)],
        ),
        compiler_params=pltpu.CompilerParams(
            dimension_semantics=("parallel",)),
    )(xf, masks, w1m, gb1, w2m, gb2)

    return yf.reshape(N, out, H, W)


# --------------------------------------------------------------------------
# Params / reference / test
# --------------------------------------------------------------------------
def _init_params(key, in_ch, mid_ch, out_ch):
    """PyTorch-shaped parameters: conv weights OIHW, per-channel 1-D vectors."""
    ks = jax.random.split(key, 8)

    def w(k, cout, cin):
        return 0.1 * jax.random.normal(k, (cout, cin, 3, 3), jnp.float32)

    def v(k, c, shift=0.0):
        return shift + 0.1 * jax.random.normal(k, (c,), jnp.float32)

    return {
        "w1": w(ks[0], mid_ch, in_ch),  "b1": v(ks[1], mid_ch),
        "g1": v(ks[2], mid_ch, 1.0),    "beta1": v(ks[3], mid_ch),
        "w2": w(ks[4], out_ch, mid_ch), "b2": v(ks[5], out_ch),
        "g2": v(ks[6], out_ch, 1.0),    "beta2": v(ks[7], out_ch),
    }


def _reference(x_nchw, params):
    """Pure-JAX reference matching the PyTorch module (incl. conv bias)."""
    def stage(x, w, b, g, beta):
        y = lax.conv_general_dilated(
            x, w, window_strides=(1, 1), padding=((1, 1), (1, 1)),
            dimension_numbers=("NCHW", "OIHW", "NCHW"))
        y = y + b.reshape(1, -1, 1, 1)
        mean = jnp.mean(y, axis=(2, 3), keepdims=True)
        var = jnp.mean((y - mean) ** 2, axis=(2, 3), keepdims=True)
        y = (y - mean) * lax.rsqrt(var + EPS)
        y = y * g.reshape(1, -1, 1, 1) + beta.reshape(1, -1, 1, 1)
        return jnp.where(y > 0, y, NEG_SLOPE * y)

    y = stage(x_nchw, params["w1"], params["b1"], params["g1"], params["beta1"])
    return stage(y, params["w2"], params["b2"], params["g2"], params["beta2"])


if __name__ == "__main__":
    key = jax.random.PRNGKey(0)
    k_x, k_p = jax.random.split(key)

    N, in_ch, mid_ch, out_ch, H, W = 2, 4, 8, 4, 16, 16
    x = jax.random.normal(k_x, (N, in_ch, H, W), jnp.float32)  # NCHW, like torch
    params = _init_params(k_p, in_ch, mid_ch, out_ch)

    packed = pack_params(params, N, H, W)          # one-time packing
    out = jax.block_until_ready(conv_block_2d(x, packed))

    ref = jax.block_until_ready(_reference(x, params))
    np.testing.assert_allclose(np.asarray(out), np.asarray(ref),
                               rtol=2e-4, atol=2e-4)
    assert out.shape == (N, out_ch, H, W)

    print("KERNEL_OK")
</pallas_src>

<mosaic_0001>
module attributes {stable_mosaic.version = 11 : i64} {
  func.func @_fused_kernel(%arg0: i32, %arg1: memref<2x4x256xf32, #tpu.memory_space<vmem>>, %arg2: memref<9x8x512xf32, #tpu.memory_space<vmem>>, %arg3: memref<8x72xf32, #tpu.memory_space<vmem>>, %arg4: memref<8x2xf32, #tpu.memory_space<vmem>>, %arg5: memref<4x72xf32, #tpu.memory_space<vmem>>, %arg6: memref<4x2xf32, #tpu.memory_space<vmem>>, %arg7: memref<2x4x256xf32, #tpu.memory_space<vmem>>, %arg8: memref<72x512xf32, #tpu.memory_space<vmem>>) attributes {dimension_semantics = [#tpu.dimension_semantics<parallel>], iteration_bounds = array<i64: 1>, scalar_prefetch = 0 : i64, scratch_operands = 1 : i64, tpu.core_type = #tpu.core_type<tc>, window_params = [{transform_indices = @transform_0, window_bounds = array<i64: 2, 4, 256>}, {pipeline_mode = #tpu.pipeline_mode<synchronous>, transform_indices = @transform_1, window_bounds = array<i64: 9, 8, 512>}, {pipeline_mode = #tpu.pipeline_mode<synchronous>, transform_indices = @transform_2, window_bounds = array<i64: 8, 72>}, {pipeline_mode = #tpu.pipeline_mode<synchronous>, transform_indices = @transform_3, window_bounds = array<i64: 8, 2>}, {pipeline_mode = #tpu.pipeline_mode<synchronous>, transform_indices = @transform_4, window_bounds = array<i64: 4, 72>}, {pipeline_mode = #tpu.pipeline_mode<synchronous>, transform_indices = @transform_5, window_bounds = array<i64: 4, 2>}, {transform_indices = @transform_6, window_bounds = array<i64: 2, 4, 256>}]} {
    %c0 = arith.constant 0 : index
    %c0_0 = arith.constant 0 : index
    %c0_1 = arith.constant 0 : index
    %0 = vector.load %arg1[%c0, %c0_0, %c0_1] : memref<2x4x256xf32, #tpu.memory_space<vmem>>, vector<1x4x256xf32>
    %1 = vector.shape_cast %0 : vector<1x4x256xf32> to vector<4x256xf32>
    %c1 = arith.constant 1 : index
    %c0_2 = arith.constant 0 : index
    %c0_3 = arith.constant 0 : index
    %2 = vector.load %arg1[%c1, %c0_2, %c0_3] : memref<2x4x256xf32, #tpu.memory_space<vmem>>, vector<1x4x256xf32>
    %3 = vector.shape_cast %2 : vector<1x4x256xf32> to vector<4x256xf32>
    %4 = tpu.concatenate %1, %3 in 1 : vector<4x256xf32>, vector<4x256xf32> -> vector<4x512xf32>
    %cst = arith.constant 0.000000e+00 : f32
    %5 = vector.broadcast %cst : f32 to vector<4x512xf32>
    %6 = tpu.concatenate %4, %5 in 0 : vector<4x512xf32>, vector<4x512xf32> -> vector<8x512xf32>
    %c0_4 = arith.constant 0 : index
    %c0_5 = arith.constant 0 : index
    %7 = vector.load %arg3[%c0_4, %c0_5] : memref<8x72xf32, #tpu.memory_space<vmem>>, vector<8x72xf32>
    %c0_6 = arith.constant 0 : index
    %c0_7 = arith.constant 0 : index
    %8 = vector.load %arg4[%c0_6, %c0_7] : memref<8x2xf32, #tpu.memory_space<vmem>>, vector<8x2xf32>
    %c17_i32 = arith.constant 17 : i32
    %9 = tpu.dynamic_rotate %6 by %c17_i32 dim 1 : vector<8x512xf32>, i32 -> vector<8x512xf32>
    %c0_8 = arith.constant 0 : index
    %c0_9 = arith.constant 0 : index
    %c0_10 = arith.constant 0 : index
    %10 = vector.load %arg2[%c0_8, %c0_9, %c0_10] : memref<9x8x512xf32, #tpu.memory_space<vmem>>, vector<1x8x512xf32>
    %11 = vector.shape_cast %10 : vector<1x8x512xf32> to vector<8x512xf32>
    %12 = arith.mulf %9, %11 : vector<8x512xf32>
    %c0_11 = arith.constant 0 : index
    %c0_12 = arith.constant 0 : index
    %13 = vector.load %arg8[%c0_11, %c0_12] : memref<72x512xf32, #tpu.memory_space<vmem>>, vector<8x512xf32>
    tpu.vector_store %arg8[%c0_11, %c0_12], %12 {strides = array<i32>} : memref<72x512xf32, #tpu.memory_space<vmem>>, vector<8x512xf32>,
    %c16_i32 = arith.constant 16 : i32
    %14 = tpu.dynamic_rotate %6 by %c16_i32 dim 1 : vector<8x512xf32>, i32 -> vector<8x512xf32>
    %c1_13 = arith.constant 1 : index
    %c0_14 = arith.constant 0 : index
    %c0_15 = arith.constant 0 : index
    %15 = vector.load %arg2[%c1_13, %c0_14, %c0_15] : memref<9x8x512xf32, #tpu.memory_space<vmem>>, vector<1x8x512xf32>
    %16 = vector.shape_cast %15 : vector<1x8x512xf32> to vector<8x512xf32>
    %17 = arith.mulf %14, %16 : vector<8x512xf32>
    %c8 = arith.constant 8 : index
    %c0_16 = arith.constant 0 : index
    %18 = vector.load %arg8[%c8, %c0_16] : memref<72x512xf32, #tpu.memory_space<vmem>>, vector<8x512xf32>
    tpu.vector_store %arg8[%c8, %c0_16], %17 {strides = array<i32>} : memref<72x512xf32, #tpu.memory_space<vmem>>, vector<8x512xf32>,
    %c15_i32 = arith.constant 15 : i32
    %19 = tpu.dynamic_rotate %6 by %c15_i32 dim 1 : vector<8x512xf32>, i32 -> vector<8x512xf32>
    %c2 = arith.constant 2 : index
    %c0_17 = arith.constant 0 : index
    %c0_18 = arith.constant 0 : index
    %20 = vector.load %arg2[%c2, %c0_17, %c0_18] : memref<9x8x512xf32, #tpu.memory_space<vmem>>, vector<1x8x512xf32>
    %21 = vector.shape_cast %20 : vector<1x8x512xf32> to vector<8x512xf32>
    %22 = arith.mulf %19, %21 : vector<8x512xf32>
    %c16 = arith.constant 16 : index
    %c0_19 = arith.constant 0 : index
    %23 = vector.load %arg8[%c16, %c0_19] : memref<72x512xf32, #tpu.memory_space<vmem>>, vector<8x512xf32>
    tpu.vector_store %arg8[%c16, %c0_19], %22 {strides = array<i32>} : memref<72x512xf32, #tpu.memory_space<vmem>>, vector<8x512xf32>,
    %c1_i32 = arith.constant 1 : i32
    %24 = tpu.dynamic_rotate %6 by %c1_i32 dim 1 : vector<8x512xf32>, i32 -> vector<8x512xf32>
    %c3 = arith.constant 3 : index
    %c0_20 = arith.constant 0 : index
    %c0_21 = arith.constant 0 : index
    %25 = vector.load %arg2[%c3, %c0_20, %c0_21] : memref<9x8x512xf32, #tpu.memory_space<vmem>>, vector<1x8x512xf32>
    %26 = vector.shape_cast %25 : vector<1x8x512xf32> to vector<8x512xf32>
    %27 = arith.mulf %24, %26 : vector<8x512xf32>
    %c24 = arith.constant 24 : index
    %c0_22 = arith.constant 0 : index
    %28 = vector.load %arg8[%c24, %c0_22] : memref<72x512xf32, #tpu.memory_space<vmem>>, vector<8x512xf32>
    tpu.vector_store %arg8[%c24, %c0_22], %27 {strides = array<i32>} : memref<72x512xf32, #tpu.memory_space<vmem>>, vector<8x512xf32>,
    %c32 = arith.constant 32 : index
    %c0_23 = arith.constant 0 : index
    %29 = vector.load %arg8[%c32, %c0_23] : memref<72x512xf32, #tpu.memory_space<vmem>>, vector<8x512xf32>
    tpu.vector_store %arg8[%c32, %c0_23], %6 {strides = array<i32>} : memref<72x512xf32, #tpu.memory_space<vmem>>, vector<8x512xf32>,
    %c511_i32 = arith.constant 511 : i32
    %30 = tpu.dynamic_rotate %6 by %c511_i32 dim 1 : vector<8x512xf32>, i32 -> vector<8x512xf32>
    %c5 = arith.constant 5 : index
    %c0_24 = arith.constant 0 : index
    %c0_25 = arith.constant 0 : index
    %31 = vector.load %arg2[%c5, %c0_24, %c0_25] : memref<9x8x512xf32, #tpu.memory_space<vmem>>, vector<1x8x512xf32>
    %32 = vector.shape_cast %31 : vector<1x8x512xf32> to vector<8x512xf32>
    %33 = arith.mulf %30, %32 : vector<8x512xf32>
    %c40 = arith.constant 40 : index
    %c0_26 = arith.constant 0 : index
    %34 = vector.load %arg8[%c40, %c0_26] : memref<72x512xf32, #tpu.memory_space<vmem>>, vector<8x512xf32>
    tpu.vector_store %arg8[%c40, %c0_26], %33 {strides = array<i32>} : memref<72x512xf32, #tpu.memory_space<vmem>>, vector<8x512xf32>,
    %c497_i32 = arith.constant 497 : i32
    %35 = tpu.dynamic_rotate %6 by %c497_i32 dim 1 : vector<8x512xf32>, i32 -> vector<8x512xf32>
    %c6 = arith.constant 6 : index
    %c0_27 = arith.constant 0 : index
    %c0_28 = arith.constant 0 : index
    %36 = vector.load %arg2[%c6, %c0_27, %c0_28] : memref<9x8x512xf32, #tpu.memory_space<vmem>>, vector<1x8x512xf32>
    %37 = vector.shape_cast %36 : vector<1x8x512xf32> to vector<8x512xf32>
    %38 = arith.mulf %35, %37 : vector<8x512xf32>
    %c48 = arith.constant 48 : index
    %c0_29 = arith.constant 0 : index
    %39 = vector.load %arg8[%c48, %c0_29] : memref<72x512xf32, #tpu.memory_space<vmem>>, vector<8x512xf32>
    tpu.vector_store %arg8[%c48, %c0_29], %38 {strides = array<i32>} : memref<72x512xf32, #tpu.memory_space<vmem>>, vector<8x512xf32>,
    %c496_i32 = arith.constant 496 : i32
    %40 = tpu.dynamic_rotate %6 by %c496_i32 dim 1 : vector<8x512xf32>, i32 -> vector<8x512xf32>
    %c7 = arith.constant 7 : index
    %c0_30 = arith.constant 0 : index
    %c0_31 = arith.constant 0 : index
    %41 = vector.load %arg2[%c7, %c0_30, %c0_31] : memref<9x8x512xf32, #tpu.memory_space<vmem>>, vector<1x8x512xf32>
    %42 = vector.shape_cast %41 : vector<1x8x512xf32> to vector<8x512xf32>
    %43 = arith.mulf %40, %42 : vector<8x512xf32>
    %c56 = arith.constant 56 : index
    %c0_32 = arith.constant 0 : index
    %44 = vector.load %arg8[%c56, %c0_32] : memref<72x512xf32, #tpu.memory_space<vmem>>, vector<8x512xf32>
    tpu.vector_store %arg8[%c56, %c0_32], %43 {strides = array<i32>} : memref<72x512xf32, #tpu.memory_space<vmem>>, vector<8x512xf32>,
    %c495_i32 = arith.constant 495 : i32
    %45 = tpu.dynamic_rotate %6 by %c495_i32 dim 1 : vector<8x512xf32>, i32 -> vector<8x512xf32>
    %c8_33 = arith.constant 8 : index
    %c0_34 = arith.constant 0 : index
    %c0_35 = arith.constant 0 : index
    %46 = vector.load %arg2[%c8_33, %c0_34, %c0_35] : memref<9x8x512xf32, #tpu.memory_space<vmem>>, vector<1x8x512xf32>
    %47 = vector.shape_cast %46 : vector<1x8x512xf32> to vector<8x512xf32>
    %48 = arith.mulf %45, %47 : vector<8x512xf32>
    %c64 = arith.constant 64 : index
    %c0_36 = arith.constant 0 : index
    %49 = vector.load %arg8[%c64, %c0_36] : memref<72x512xf32, #tpu.memory_space<vmem>>, vector<8x512xf32>
    tpu.vector_store %arg8[%c64, %c0_36], %48 {strides = array<i32>} : memref<72x512xf32, #tpu.memory_space<vmem>>, vector<8x512xf32>,
    %c0_37 = arith.constant 0 : index
    %c0_38 = arith.constant 0 : index
    %50 = vector.load %arg8[%c0_37, %c0_38] : memref<72x512xf32, #tpu.memory_space<vmem>>, vector<72x512xf32>
    %cst_39 = arith.constant dense<0.000000e+00> : vector<8x512xf32>
    %51 = tpu.matmul %7, %50, %cst_39 {dimension_numbers = #tpu.dot_dimension_numbers<[1], [0], [0], [1], [0, 0, 1, 1], [], []>} : vector<8x72xf32>, vector<72x512xf32>, vector<8x512xf32> -> vector<8x512xf32>
    %52 = vector.extract_strided_slice %8 {offsets = [0, 0], sizes = [8, 1], strides = [1, 1]} : vector<8x2xf32> to vector<8x1xf32>
    %53 = vector.extract_strided_slice %8 {offsets = [0, 1], sizes = [8, 1], strides = [1, 1]} : vector<8x2xf32> to vector<8x1xf32>
    %54 = vector.extract_strided_slice %51 {offsets = [0, 0], sizes = [8, 256], strides = [1, 1]} : vector<8x512xf32> to vector<8x256xf32>
    %55 = arith.mulf %54, %54 : vector<8x256xf32>
    %56 = tpu.concatenate %54, %55 in 0 : vector<8x256xf32>, vector<8x256xf32> -> vector<16x256xf32>
    %cst_40 = arith.constant dense<0.000000e+00> : vector<16xf32>
    %57 = vector.multi_reduction <add>, %56, %cst_40 [1] : vector<16x256xf32> to vector<16xf32>
    %58 = vector.shape_cast %57 : vector<16xf32> to vector<16x1xf32>
    %59 = vector.extract_strided_slice %58 {offsets = [0, 0], sizes = [8, 1], strides = [1, 1]} : vector<16x1xf32> to vector<8x1xf32>
    %cst_41 = arith.constant 3.906250e-03 : f32
    %60 = vector.broadcast %cst_41 : f32 to vector<8x1xf32>
    %61 = arith.mulf %59, %60 : vector<8x1xf32>
    %62 = vector.extract_strided_slice %58 {offsets = [8, 0], sizes = [8, 1], strides = [1, 1]} : vector<16x1xf32> to vector<8x1xf32>
    %cst_42 = arith.constant 3.906250e-03 : f32
    %63 = vector.broadcast %cst_42 : f32 to vector<8x1xf32>
    %64 = arith.mulf %62, %63 : vector<8x1xf32>
    %65 = arith.mulf %61, %61 : vector<8x1xf32>
    %66 = arith.subf %64, %65 : vector<8x1xf32>
    %cst_43 = arith.constant 9.99999974E-6 : f32
    %67 = vector.broadcast %cst_43 : f32 to vector<8x1xf32>
    %68 = arith.addf %66, %67 : vector<8x1xf32>
    %69 = math.rsqrt %68 : vector<8x1xf32>
    %70 = arith.mulf %52, %69 : vector<8x1xf32>
    %71 = arith.mulf %61, %70 : vector<8x1xf32>
    %72 = arith.subf %53, %71 : vector<8x1xf32>
    %73 = vector.broadcast %70 : vector<8x1xf32> to vector<8x256xf32>
    %74 = arith.mulf %54, %73 : vector<8x256xf32>
    %75 = vector.broadcast %72 : vector<8x1xf32> to vector<8x256xf32>
    %76 = arith.addf %74, %75 : vector<8x256xf32>
    %cst_44 = arith.constant 1.000000e-01 : f32
    %77 = vector.broadcast %cst_44 : f32 to vector<8x256xf32>
    %78 = arith.mulf %77, %76 : vector<8x256xf32>
    %79 = arith.maximumf %76, %78 : vector<8x256xf32>
    %80 = vector.extract_strided_slice %51 {offsets = [0, 256], sizes = [8, 256], strides = [1, 1]} : vector<8x512xf32> to vector<8x256xf32>
    %81 = arith.mulf %80, %80 : vector<8x256xf32>
    %82 = tpu.concatenate %80, %81 in 0 : vector<8x256xf32>, vector<8x256xf32> -> vector<16x256xf32>
    %cst_45 = arith.constant dense<0.000000e+00> : vector<16xf32>
    %83 = vector.multi_reduction <add>, %82, %cst_45 [1] : vector<16x256xf32> to vector<16xf32>
    %84 = vector.shape_cast %83 : vector<16xf32> to vector<16x1xf32>
    %85 = vector.extract_strided_slice %84 {offsets = [0, 0], sizes = [8, 1], strides = [1, 1]} : vector<16x1xf32> to vector<8x1xf32>
    %cst_46 = arith.constant 3.906250e-03 : f32
    %86 = vector.broadcast %cst_46 : f32 to vector<8x1xf32>
    %87 = arith.mulf %85, %86 : vector<8x1xf32>
    %88 = vector.extract_strided_slice %84 {offsets = [8, 0], sizes = [8, 1], strides = [1, 1]} : vector<16x1xf32> to vector<8x1xf32>
    %cst_47 = arith.constant 3.906250e-03 : f32
    %89 = vector.broadcast %cst_47 : f32 to vector<8x1xf32>
    %90 = arith.mulf %88, %89 : vector<8x1xf32>
    %91 = arith.mulf %87, %87 : vector<8x1xf32>
    %92 = arith.subf %90, %91 : vector<8x1xf32>
    %cst_48 = arith.constant 9.99999974E-6 : f32
    %93 = vector.broadcast %cst_48 : f32 to vector<8x1xf32>
    %94 = arith.addf %92, %93 : vector<8x1xf32>
    %95 = math.rsqrt %94 : vector<8x1xf32>
    %96 = arith.mulf %52, %95 : vector<8x1xf32>
    %97 = arith.mulf %87, %96 : vector<8x1xf32>
    %98 = arith.subf %53, %97 : vector<8x1xf32>
    %99 = vector.broadcast %96 : vector<8x1xf32> to vector<8x256xf32>
    %100 = arith.mulf %80, %99 : vector<8x256xf32>
    %101 = vector.broadcast %98 : vector<8x1xf32> to vector<8x256xf32>
    %102 = arith.addf %100, %101 : vector<8x256xf32>
    %cst_49 = arith.constant 1.000000e-01 : f32
    %103 = vector.broadcast %cst_49 : f32 to vector<8x256xf32>
    %104 = arith.mulf %103, %102 : vector<8x256xf32>
    %105 = arith.maximumf %102, %104 : vector<8x256xf32>
    %106 = tpu.concatenate %79, %105 in 1 : vector<8x256xf32>, vector<8x256xf32> -> vector<8x512xf32>
    %c0_50 = arith.constant 0 : index
    %c0_51 = arith.constant 0 : index
    %107 = vector.load %arg5[%c0_50, %c0_51] : memref<4x72xf32, #tpu.memory_space<vmem>>, vector<4x72xf32>
    %c0_52 = arith.constant 0 : index
    %c0_53 = arith.constant 0 : index
    %108 = vector.load %arg6[%c0_52, %c0_53] : memref<4x2xf32, #tpu.memory_space<vmem>>, vector<4x2xf32>
    %c17_i32_54 = arith.constant 17 : i32
    %109 = tpu.dynamic_rotate %106 by %c17_i32_54 dim 1 : vector<8x512xf32>, i32 -> vector<8x512xf32>
    %c0_55 = arith.constant 0 : index
    %c0_56 = arith.constant 0 : index
    %c0_57 = arith.constant 0 : index
    %110 = vector.load %arg2[%c0_55, %c0_56, %c0_57] : memref<9x8x512xf32, #tpu.memory_space<vmem>>, vector<1x8x512xf32>
    %111 = vector.shape_cast %110 : vector<1x8x512xf32> to vector<8x512xf32>
    %112 = arith.mulf %109, %111 : vector<8x512xf32>
    %c0_58 = arith.constant 0 : index
    %c0_59 = arith.constant 0 : index
    %113 = vector.load %arg8[%c0_58, %c0_59] : memref<72x512xf32, #tpu.memory_space<vmem>>, vector<8x512xf32>
    tpu.vector_store %arg8[%c0_58, %c0_59], %112 {strides = array<i32>} : memref<72x512xf32, #tpu.memory_space<vmem>>, vector<8x512xf32>,
    %c16_i32_60 = arith.constant 16 : i32
    %114 = tpu.dynamic_rotate %106 by %c16_i32_60 dim 1 : vector<8x512xf32>, i32 -> vector<8x512xf32>
    %c1_61 = arith.constant 1 : index
    %c0_62 = arith.constant 0 : index
    %c0_63 = arith.constant 0 : index
    %115 = vector.load %arg2[%c1_61, %c0_62, %c0_63] : memref<9x8x512xf32, #tpu.memory_space<vmem>>, vector<1x8x512xf32>
    %116 = vector.shape_cast %115 : vector<1x8x512xf32> to vector<8x512xf32>
    %117 = arith.mulf %114, %116 : vector<8x512xf32>
    %c8_64 = arith.constant 8 : index
    %c0_65 = arith.constant 0 : index
    %118 = vector.load %arg8[%c8_64, %c0_65] : memref<72x512xf32, #tpu.memory_space<vmem>>, vector<8x512xf32>
    tpu.vector_store %arg8[%c8_64, %c0_65], %117 {strides = array<i32>} : memref<72x512xf32, #tpu.memory_space<vmem>>, vector<8x512xf32>,
    %c15_i32_66 = arith.constant 15 : i32
    %119 = tpu.dynamic_rotate %106 by %c15_i32_66 dim 1 : vector<8x512xf32>, i32 -> vector<8x512xf32>
    %c2_67 = arith.constant 2 : index
    %c0_68 = arith.constant 0 : index
    %c0_69 = arith.constant 0 : index
    %120 = vector.load %arg2[%c2_67, %c0_68, %c0_69] : memref<9x8x512xf32, #tpu.memory_space<vmem>>, vector<1x8x512xf32>
    %121 = vector.shape_cast %120 : vector<1x8x512xf32> to vector<8x512xf32>
    %122 = arith.mulf %119, %121 : vector<8x512xf32>
    %c16_70 = arith.constant 16 : index
    %c0_71 = arith.constant 0 : index
    %123 = vector.load %arg8[%c16_70, %c0_71] : memref<72x512xf32, #tpu.memory_space<vmem>>, vector<8x512xf32>
    tpu.vector_store %arg8[%c16_70, %c0_71], %122 {strides = array<i32>} : memref<72x512xf32, #tpu.memory_space<vmem>>, vector<8x512xf32>,
    %c1_i32_72 = arith.constant 1 : i32
    %124 = tpu.dynamic_rotate %106 by %c1_i32_72 dim 1 : vector<8x512xf32>, i32 -> vector<8x512xf32>
    %c3_73 = arith.constant 3 : index
    %c0_74 = arith.constant 0 : index
    %c0_75 = arith.constant 0 : index
    %125 = vector.load %arg2[%c3_73, %c0_74, %c0_75] : memref<9x8x512xf32, #tpu.memory_space<vmem>>, vector<1x8x512xf32>
    %126 = vector.shape_cast %125 : vector<1x8x512xf32> to vector<8x512xf32>
    %127 = arith.mulf %124, %126 : vector<8x512xf32>
    %c24_76 = arith.constant 24 : index
    %c0_77 = arith.constant 0 : index
    %128 = vector.load %arg8[%c24_76, %c0_77] : memref<72x512xf32, #tpu.memory_space<vmem>>, vector<8x512xf32>
    tpu.vector_store %arg8[%c24_76, %c0_77], %127 {strides = array<i32>} : memref<72x512xf32, #tpu.memory_space<vmem>>, vector<8x512xf32>,
    %c32_78 = arith.constant 32 : index
    %c0_79 = arith.constant 0 : index
    %129 = vector.load %arg8[%c32_78, %c0_79] : memref<72x512xf32, #tpu.memory_space<vmem>>, vector<8x512xf32>
    tpu.vector_store %arg8[%c32_78, %c0_79], %106 {strides = array<i32>} : memref<72x512xf32, #tpu.memory_space<vmem>>, vector<8x512xf32>,
    %c511_i32_80 = arith.constant 511 : i32
    %130 = tpu.dynamic_rotate %106 by %c511_i32_80 dim 1 : vector<8x512xf32>, i32 -> vector<8x512xf32>
    %c5_81 = arith.constant 5 : index
    %c0_82 = arith.constant 0 : index
    %c0_83 = arith.constant 0 : index
    %131 = vector.load %arg2[%c5_81, %c0_82, %c0_83] : memref<9x8x512xf32, #tpu.memory_space<vmem>>, vector<1x8x512xf32>
    %132 = vector.shape_cast %131 : vector<1x8x512xf32> to vector<8x512xf32>
    %133 = arith.mulf %130, %132 : vector<8x512xf32>
    %c40_84 = arith.constant 40 : index
    %c0_85 = arith.constant 0 : index
    %134 = vector.load %arg8[%c40_84, %c0_85] : memref<72x512xf32, #tpu.memory_space<vmem>>, vector<8x512xf32>
    tpu.vector_store %arg8[%c40_84, %c0_85], %133 {strides = array<i32>} : memref<72x512xf32, #tpu.memory_space<vmem>>, vector<8x512xf32>,
    %c497_i32_86 = arith.constant 497 : i32
    %135 = tpu.dynamic_rotate %106 by %c497_i32_86 dim 1 : vector<8x512xf32>, i32 -> vector<8x512xf32>
    %c6_87 = arith.constant 6 : index
    %c0_88 = arith.constant 0 : index
    %c0_89 = arith.constant 0 : index
    %136 = vector.load %arg2[%c6_87, %c0_88, %c0_89] : memref<9x8x512xf32, #tpu.memory_space<vmem>>, vector<1x8x512xf32>
    %137 = vector.shape_cast %136 : vector<1x8x512xf32> to vector<8x512xf32>
    %138 = arith.mulf %135, %137 : vector<8x512xf32>
    %c48_90 = arith.constant 48 : index
    %c0_91 = arith.constant 0 : index
    %139 = vector.load %arg8[%c48_90, %c0_91] : memref<72x512xf32, #tpu.memory_space<vmem>>, vector<8x512xf32>
    tpu.vector_store %arg8[%c48_90, %c0_91], %138 {strides = array<i32>} : memref<72x512xf32, #tpu.memory_space<vmem>>, vector<8x512xf32>,
    %c496_i32_92 = arith.constant 496 : i32
    %140 = tpu.dynamic_rotate %106 by %c496_i32_92 dim 1 : vector<8x512xf32>, i32 -> vector<8x512xf32>
    %c7_93 = arith.constant 7 : index
    %c0_94 = arith.constant 0 : index
    %c0_95 = arith.constant 0 : index
    %141 = vector.load %arg2[%c7_93, %c0_94, %c0_95] : memref<9x8x512xf32, #tpu.memory_space<vmem>>, vector<1x8x512xf32>
    %142 = vector.shape_cast %141 : vector<1x8x512xf32> to vector<8x512xf32>
    %143 = arith.mulf %140, %142 : vector<8x512xf32>
    %c56_96 = arith.constant 56 : index
    %c0_97 = arith.constant 0 : index
    %144 = vector.load %arg8[%c56_96, %c0_97] : memref<72x512xf32, #tpu.memory_space<vmem>>, vector<8x512xf32>
    tpu.vector_store %arg8[%c56_96, %c0_97], %143 {strides = array<i32>} : memref<72x512xf32, #tpu.memory_space<vmem>>, vector<8x512xf32>,
    %c495_i32_98 = arith.constant 495 : i32
    %145 = tpu.dynamic_rotate %106 by %c495_i32_98 dim 1 : vector<8x512xf32>, i32 -> vector<8x512xf32>
    %c8_99 = arith.constant 8 : index
    %c0_100 = arith.constant 0 : index
    %c0_101 = arith.constant 0 : index
    %146 = vector.load %arg2[%c8_99, %c0_100, %c0_101] : memref<9x8x512xf32, #tpu.memory_space<vmem>>, vector<1x8x512xf32>
    %147 = vector.shape_cast %146 : vector<1x8x512xf32> to vector<8x512xf32>
    %148 = arith.mulf %145, %147 : vector<8x512xf32>
    %c64_102 = arith.constant 64 : index
    %c0_103 = arith.constant 0 : index
    %149 = vector.load %arg8[%c64_102, %c0_103] : memref<72x512xf32, #tpu.memory_space<vmem>>, vector<8x512xf32>
    tpu.vector_store %arg8[%c64_102, %c0_103], %148 {strides = array<i32>} : memref<72x512xf32, #tpu.memory_space<vmem>>, vector<8x512xf32>,
    %c0_104 = arith.constant 0 : index
    %c0_105 = arith.constant 0 : index
    %150 = vector.load %arg8[%c0_104, %c0_105] : memref<72x512xf32, #tpu.memory_space<vmem>>, vector<72x512xf32>
    %cst_106 = arith.constant dense<0.000000e+00> : vector<4x512xf32>
    %151 = tpu.matmul %107, %150, %cst_106 {dimension_numbers = #tpu.dot_dimension_numbers<[1], [0], [0], [1], [0, 0, 1, 1], [], []>} : vector<4x72xf32>, vector<72x512xf32>, vector<4x512xf32> -> vector<4x512xf32>
    %152 = vector.extract_strided_slice %108 {offsets = [0, 0], sizes = [4, 1], strides = [1, 1]} : vector<4x2xf32> to vector<4x1xf32>
    %153 = vector.extract_strided_slice %108 {offsets = [0, 1], sizes = [4, 1], strides = [1, 1]} : vector<4x2xf32> to vector<4x1xf32>
    %154 = vector.extract_strided_slice %151 {offsets = [0, 0], sizes = [4, 256], strides = [1, 1]} : vector<4x512xf32> to vector<4x256xf32>
    %155 = arith.mulf %154, %154 : vector<4x256xf32>
    %156 = tpu.concatenate %154, %155 in 0 : vector<4x256xf32>, vector<4x256xf32> -> vector<8x256xf32>
    %cst_107 = arith.constant dense<0.000000e+00> : vector<8xf32>
    %157 = vector.multi_reduction <add>, %156, %cst_107 [1] : vector<8x256xf32> to vector<8xf32>
    %158 = vector.shape_cast %157 : vector<8xf32> to vector<8x1xf32>
    %159 = vector.extract_strided_slice %158 {offsets = [0, 0], sizes = [4, 1], strides = [1, 1]} : vector<8x1xf32> to vector<4x1xf32>
    %cst_108 = arith.constant 3.906250e-03 : f32
    %160 = vector.broadcast %cst_108 : f32 to vector<4x1xf32>
    %161 = arith.mulf %159, %160 : vector<4x1xf32>
    %162 = vector.extract_strided_slice %158 {offsets = [4, 0], sizes = [4, 1], strides = [1, 1]} : vector<8x1xf32> to vector<4x1xf32>
    %cst_109 = arith.constant 3.906250e-03 : f32
    %163 = vector.broadcast %cst_109 : f32 to vector<4x1xf32>
    %164 = arith.mulf %162, %163 : vector<4x1xf32>
    %165 = arith.mulf %161, %161 : vector<4x1xf32>
    %166 = arith.subf %164, %165 : vector<4x1xf32>
    %cst_110 = arith.constant 9.99999974E-6 : f32
    %167 = vector.broadcast %cst_110 : f32 to vector<4x1xf32>
    %168 = arith.addf %166, %167 : vector<4x1xf32>
    %169 = math.rsqrt %168 : vector<4x1xf32>
    %170 = arith.mulf %152, %169 : vector<4x1xf32>
    %171 = arith.mulf %161, %170 : vector<4x1xf32>
    %172 = arith.subf %153, %171 : vector<4x1xf32>
    %173 = vector.broadcast %170 : vector<4x1xf32> to vector<4x256xf32>
    %174 = arith.mulf %154, %173 : vector<4x256xf32>
    %175 = vector.broadcast %172 : vector<4x1xf32> to vector<4x256xf32>
    %176 = arith.addf %174, %175 : vector<4x256xf32>
    %cst_111 = arith.constant 1.000000e-01 : f32
    %177 = vector.broadcast %cst_111 : f32 to vector<4x256xf32>
    %178 = arith.mulf %177, %176 : vector<4x256xf32>
    %179 = arith.maximumf %176, %178 : vector<4x256xf32>
    %180 = vector.extract_strided_slice %151 {offsets = [0, 256], sizes = [4, 256], strides = [1, 1]} : vector<4x512xf32> to vector<4x256xf32>
    %181 = arith.mulf %180, %180 : vector<4x256xf32>
    %182 = tpu.concatenate %180, %181 in 0 : vector<4x256xf32>, vector<4x256xf32> -> vector<8x256xf32>
    %cst_112 = arith.constant dense<0.000000e+00> : vector<8xf32>
    %183 = vector.multi_reduction <add>, %182, %cst_112 [1] : vector<8x256xf32> to vector<8xf32>
    %184 = vector.shape_cast %183 : vector<8xf32> to vector<8x1xf32>
    %185 = vector.extract_strided_slice %184 {offsets = [0, 0], sizes = [4, 1], strides = [1, 1]} : vector<8x1xf32> to vector<4x1xf32>
    %cst_113 = arith.constant 3.906250e-03 : f32
    %186 = vector.broadcast %cst_113 : f32 to vector<4x1xf32>
    %187 = arith.mulf %185, %186 : vector<4x1xf32>
    %188 = vector.extract_strided_slice %184 {offsets = [4, 0], sizes = [4, 1], strides = [1, 1]} : vector<8x1xf32> to vector<4x1xf32>
    %cst_114 = arith.constant 3.906250e-03 : f32
    %189 = vector.broadcast %cst_114 : f32 to vector<4x1xf32>
    %190 = arith.mulf %188, %189 : vector<4x1xf32>
    %191 = arith.mulf %187, %187 : vector<4x1xf32>
    %192 = arith.subf %190, %191 : vector<4x1xf32>
    %cst_115 = arith.constant 9.99999974E-6 : f32
    %193 = vector.broadcast %cst_115 : f32 to vector<4x1xf32>
    %194 = arith.addf %192, %193 : vector<4x1xf32>
    %195 = math.rsqrt %194 : vector<4x1xf32>
    %196 = arith.mulf %152, %195 : vector<4x1xf32>
    %197 = arith.mulf %187, %196 : vector<4x1xf32>
    %198 = arith.subf %153, %197 : vector<4x1xf32>
    %199 = vector.broadcast %196 : vector<4x1xf32> to vector<4x256xf32>
    %200 = arith.mulf %180, %199 : vector<4x256xf32>
    %201 = vector.broadcast %198 : vector<4x1xf32> to vector<4x256xf32>
    %202 = arith.addf %200, %201 : vector<4x256xf32>
    %cst_116 = arith.constant 1.000000e-01 : f32
    %203 = vector.broadcast %cst_116 : f32 to vector<4x256xf32>
    %204 = arith.mulf %203, %202 : vector<4x256xf32>
    %205 = arith.maximumf %202, %204 : vector<4x256xf32>
    %c0_117 = arith.constant 0 : index
    %c0_118 = arith.constant 0 : index
    %c0_119 = arith.constant 0 : index
    %206 = vector.load %arg7[%c0_117, %c0_118, %c0_119] : memref<2x4x256xf32, #tpu.memory_space<vmem>>, vector<1x4x256xf32>
    %207 = vector.shape_cast %206 : vector<1x4x256xf32> to vector<4x256xf32>
    %208 = vector.shape_cast %179 : vector<4x256xf32> to vector<1x4x256xf32>
    tpu.vector_store %arg7[%c0_117, %c0_118, %c0_119], %208 {strides = array<i32>} : memref<2x4x256xf32, #tpu.memory_space<vmem>>, vector<1x4x256xf32>,
    %c1_120 = arith.constant 1 : index
    %c0_121 = arith.constant 0 : index
    %c0_122 = arith.constant 0 : index
    %209 = vector.load %arg7[%c1_120, %c0_121, %c0_122] : memref<2x4x256xf32, #tpu.memory_space<vmem>>, vector<1x4x256xf32>
    %210 = vector.shape_cast %209 : vector<1x4x256xf32> to vector<4x256xf32>
    %211 = vector.shape_cast %205 : vector<4x256xf32> to vector<1x4x256xf32>
    tpu.vector_store %arg7[%c1_120, %c0_121, %c0_122], %211 {strides = array<i32>} : memref<2x4x256xf32, #tpu.memory_space<vmem>>, vector<1x4x256xf32>,
    return
  }
  func.func @transform_0(%arg0: i32) -> (i32, i32, i32) {
    %c0_i32 = arith.constant 0 : i32
    %c0_i32_0 = arith.constant 0 : i32
    %c0_i32_1 = arith.constant 0 : i32
    return %arg0, %c0_i32, %c0_i32_0 : i32, i32, i32
  }
  func.func @transform_1(%arg0: i32) -> (i32, i32, i32) {
    %c0_i32 = arith.constant 0 : i32
    %c0_i32_0 = arith.constant 0 : i32
    %c0_i32_1 = arith.constant 0 : i32
    %c0_i32_2 = arith.constant 0 : i32
    return %c0_i32, %c0_i32_0, %c0_i32_1 : i32, i32, i32
  }
  func.func @transform_2(%arg0: i32) -> (i32, i32) {
    %c0_i32 = arith.constant 0 : i32
    %c0_i32_0 = arith.constant 0 : i32
    %c0_i32_1 = arith.constant 0 : i32
    return %c0_i32, %c0_i32_0 : i32, i32
  }
  func.func @transform_3(%arg0: i32) -> (i32, i32) {
    %c0_i32 = arith.constant 0 : i32
    %c0_i32_0 = arith.constant 0 : i32
    %c0_i32_1 = arith.constant 0 : i32
    return %c0_i32, %c0_i32_0 : i32, i32
  }
  func.func @transform_4(%arg0: i32) -> (i32, i32) {
    %c0_i32 = arith.constant 0 : i32
    %c0_i32_0 = arith.constant 0 : i32
    %c0_i32_1 = arith.constant 0 : i32
    return %c0_i32, %c0_i32_0 : i32, i32
  }
  func.func @transform_5(%arg0: i32) -> (i32, i32) {
    %c0_i32 = arith.constant 0 : i32
    %c0_i32_0 = arith.constant 0 : i32
    %c0_i32_1 = arith.constant 0 : i32
    return %c0_i32, %c0_i32_0 : i32, i32
  }
  func.func @transform_6(%arg0: i32) -> (i32, i32, i32) {
    %c0_i32 = arith.constant 0 : i32
    %c0_i32_0 = arith.constant 0 : i32
    %c0_i32_1 = arith.constant 0 : i32
    return %arg0, %c0_i32, %c0_i32_0 : i32, i32, i32
  }
}

</mosaic_0001>

<bundles_post_ra>
// kernel: conv_block_2d.1
= control target key start
LH: loop header
LB: loop body
LE: loop exit
PB: predicated region body
PF: predicated region fallthrough
CT: control target
= control target key end

     0   :  { %11 = vsyncpa [#allocation4], 0  ;;  %s1009_s24 = smov [#allocation3]   ;;  %s1010_s26 = smov 512   ;;  %s1588_s0 = inlined_call_operand.vmem [shape: f32[2,4,256], index: 0, kind: input, shape index: {}]   ;;  %s1589_s1 = inlined_call_operand.hbm [shape: f32[9,8,512], index: 1, kind: input, shape index: {}]   ;;  %s1590_s2 = inlined_call_operand.vmem [shape: f32[8,72], index: 2, kind: input, shape index: {}]   ;;  %s1591_s3 = inlined_call_operand.vmem [shape: f32[8,2], index: 3, kind: input, shape index: {}]   ;;  %s1592_s4 = inlined_call_operand.vmem [shape: f32[4,72], index: 4, kind: input, shape index: {}]   ;;  %s1593_s5 = inlined_call_operand.vmem [shape: f32[4,2], index: 5, kind: input, shape index: {}]   ;;  %s1594_s6 = inlined_call_operand.vmem [shape: f32[2,4,256], index: 6, kind: output, shape index: {}]  }
   0x1   :  { %s18_s23 = sshll.u32 %s1589_s1, 4  ;;  %s20_s25 = sshll.u32 %s1009_s24, 4  ;;  %s19_s23 = int_to_ptr.hbm [resolvable:$true] %s18_s23  ;;  %s21_s25 = int_to_ptr.vmem [resolvable:$true] %s20_s25 }
   0x2   :  { %s1011_s27 = smov 32  }
   0x3   :  { %26 = dma.hbm_to_vmem [thread:$0]  %s19_s23, 4608, %s21_s25, [#allocation4], %s1010_s26, %s1010_s26, %s1011_s27  }
   0x4   :  { %1007 = dma.done.wait [#allocation4], 4608  }
   0x5   :  { %1008 = vsyncadd [#allocation4], 4294962688  ;;  %v39_v0 = vld [vmem:[%s1588_s0] sm:$0xff]  ;;  %v941_v1 = vld [vmem:[%s1588_s0 + $0x8] sm:$0xff]  ;;  %vm54_vm0 = vcmask 1043456   ;;  %s1012_s1 = smov 112   ;;  %v69_v12 = vlaneseq }
   0x6   :  { %43 = vst [vmem:[#allocation1] ss:$2 sm:$0xff] %v39_v0  ;;  %s1013_s8 = smov 111   ;;  %s1014_s0 = smov 113   ;;  %v1118_v17 = vld [vmem:[#allocation3 + $0x118] sm:$0xff]  ;;  %v1147_v35 = vld [vmem:[#allocation3 + $0x110] sm:$0xff] }
   0x7   :  { %s1015_s9 = smov 127   ;;  %s1016_s10 = smov 1   ;;  %v1114_v16 = vand.u32 127, %v69_v12  ;;  %v1125_v23 = vld [vmem:[#allocation3 + $0xf8] sm:$0xff]  ;;  %v1155_v40 = vld [vmem:[#allocation3 + $0xf0] sm:$0xff]  ;;  %v1169_v49 = vld [vmem:[#allocation3 + $0x100] sm:$0xff] }
   0x8   :  { %s1017_s11 = smov 15   ;;  %s1018_s12 = smov 16   ;;  %v1130_v26 = vld [vmem:[#allocation3 + $0xd8] sm:$0xff]  ;;  %v1160_v43 = vld [vmem:[#allocation3 + $0xd0] sm:$0xff]  ;;  %v1171_v50 = vld [vmem:[#allocation3 + $0x108] sm:$0xff]  ;;  %vm310_vm9 = vcmask 588800  }
   0x9   :  { %s1019_s13 = smov 17   ;;  %vm230_vm1 = vcmp.lt.s32.totalorder %v1114_v16, 112  ;;  %vm256_vm2 = vcmp.lt.s32.totalorder %v1114_v16, 111  ;;  %vm204_vm3 = vcmp.lt.s32.totalorder %v1114_v16, 113  ;;  %vm178_vm4 = vcmp.lt.s32.totalorder %v1114_v16, 127  ;;  %v1135_v29 = vld [vmem:[#allocation3 + $0xb8] sm:$0xff] }
   0xa   :  { %v1166_v47 = vld [vmem:[#allocation3 + $0xb0] sm:$0xff]  ;;  %v1182_v58 = vld [vmem:[#allocation3 + $0xe0] sm:$0xff]  ;;  %v1184_v59 = vld [vmem:[#allocation3 + $0xe8] sm:$0xff]  ;;  %vm148_vm5 = vcmp.lt.s32.totalorder %v1114_v16, 1  ;;  %vm122_vm6 = vcmp.lt.s32.totalorder %v1114_v16, 15  ;;  %vm96_vm7 = vcmp.lt.s32.totalorder %v1114_v16, 16 }
   0xb   :  { %v1192_v0 = vld [vmem:[#allocation3 + $0xc0] sm:$0xff]  ;;  %vm71_vm8 = vcmp.lt.s32.totalorder %v1114_v16, 17 }
   0xd   :  { %v1066_v2 = vld.sshfl [vmem:[#allocation1] sm:$0xff pattern:$0x75316420]  ;;  %v1068_v3 = vld.sshfl [vmem:[#allocation1 + $0x8] sm:$0xff pattern:$0x75316420] }
   0xe   :  { %v55_v4 = vsel %vm54_vm0, %v1066_v2, 0.0  ;;  %49 = vst [vmem:[#allocation1] ss:$2 sm:$0xff] %v941_v1  ;;  %v56_v9 = vsel %vm54_vm0, %v1068_v3, 0.0  ;;  %v1194_v1 = vld [vmem:[#allocation3 + $0xc8] sm:$0xff] }
   0xf   :  { %222 = vrot.lane.b32.xlu1 %v55_v4, %s1012_s1  ;;  %248 = vrot.lane.b32.xlu0 %v55_v4, %s1013_s8 }
  0x15   :  { %v1074_v5 = vld.sshfl [vmem:[#allocation1 + $0x8] sm:$0xff pattern:$0x75316420]  ;;  %v1076_v6 = vld.sshfl [vmem:[#allocation1] sm:$0xff pattern:$0x75316420] }
  0x16   :  { %v58_v7 = vsel %vm54_vm0, %v1074_v5, 0.0  ;;  %v57_v8 = vsel %vm54_vm0, %v1076_v6, 0.0 }
  0x17   :  { %196 = vrot.lane.b32.xlu0 %v55_v4, %s1014_s0  ;;  %254 = vrot.lane.b32.xlu1 %v58_v7, %s1013_s8 }
  0x18   :  { %226 = vrot.lane.b32.xlu2 %v57_v8, %s1012_s1 }
  0x1f   :  { %170 = vrot.lane.b32.xlu0 %v55_v4, %s1015_s9  ;;  %200 = vrot.lane.b32.xlu1 %v57_v8, %s1014_s0 }
  0x20   :  { %228 = vrot.lane.b32.xlu2 %v58_v7, %s1012_s1 }
  0x27   :  { %174 = vrot.lane.b32.xlu1 %v57_v8, %s1015_s9  ;;  %252 = vrot.lane.b32.xlu0 %v57_v8, %s1013_s8 }
  0x28   :  { %202 = vrot.lane.b32.xlu2 %v58_v7, %s1014_s0 }
  0x2f   :  { %224 = vrot.lane.b32.xlu1 %v56_v9, %s1012_s1  ;;  %250 = vrot.lane.b32.xlu0 %v56_v9, %s1013_s8 }
  0x30   :  { %176 = vrot.lane.b32.xlu2 %v58_v7, %s1015_s9 }
  0x37   :  { %146 = vrot.lane.b32.xlu1 %v58_v7, %s1016_s10  ;;  %144 = vrot.lane.b32.xlu0 %v57_v8, %s1016_s10 }
  0x38   :  { %142 = vrot.lane.b32.xlu2 %v56_v9, %s1016_s10 }
  0x3f   :  { %118 = vrot.lane.b32.xlu1 %v57_v8, %s1017_s11  ;;  %116 = vrot.lane.b32.xlu0 %v56_v9, %s1017_s11 }
  0x40   :  { %198 = vrot.lane.b32.xlu2 %v56_v9, %s1014_s0 }
  0x47   :  { %90 = vrot.lane.b32.xlu1 %v56_v9, %s1018_s12  ;;  %172 = vrot.lane.b32.xlu0 %v56_v9, %s1015_s9 }
  0x48   :  { %120 = vrot.lane.b32.xlu2 %v58_v7, %s1017_s11 }
  0x4f   :  { %63 = vrot.lane.b32.xlu1 %v56_v9, %s1019_s13  ;;  %94 = vrot.lane.b32.xlu0 %v58_v7, %s1018_s12 }
  0x50   :  { %92 = vrot.lane.b32.xlu2 %v57_v8, %s1018_s12 }
  0x57   :  { %140 = vrot.lane.b32.xlu1 %v55_v4, %s1016_s10  ;;  %67 = vrot.lane.b32.xlu0 %v58_v7, %s1019_s13 }
  0x58   :  { %65 = vrot.lane.b32.xlu2 %v57_v8, %s1019_s13 }
  0x5f   :  { %61 = vrot.lane.b32.xlu1 %v55_v4, %s1019_s13  ;;  %88 = vrot.lane.b32.xlu0 %v55_v4, %s1018_s12 }
  0x60   :  { %114 = vrot.lane.b32.xlu2 %v55_v4, %s1017_s11 }
  0x72   :  { %v227_v10 = vpop.permute.xlu2 %226 }
  0x7a   :  { %v229_v11 = vpop.permute.xlu2 %228 }
  0x7b   :  { %v231_v38 = vsel %vm230_vm1, %v227_v10, %v229_v11 }
  0x7c   :  { %v242_v44 = vmul.f32 %v1155_v40, %v231_v38 }
  0x81   :  { %v223_v13 = vpop.permute.xlu1 %222  ;;  %v249_v14 = vpop.permute.xlu0 %248 }
  0x82   :  { %v203_v15 = vpop.permute.xlu2 %202  ;;  %v234_v20 = vsel %vm230_vm1, %v229_v11, %v223_v13  ;;  %v1207_v11 = vld [vmem:[#allocation3 + $0x78] sm:$0xff] }
  0x83   :  { %v243_v27 = vmul.f32 %v1125_v23, %v234_v20  ;;  %v1222_v20 = vld [vmem:[#allocation3 + $0x58] sm:$0xff] }
  0x89   :  { %v197_v18 = vpop.permute.xlu0 %196  ;;  %v255_v19 = vpop.permute.xlu1 %254 }
  0x8a   :  { %v177_v21 = vpop.permute.xlu2 %176  ;;  %v260_v22 = vsel %vm256_vm2, %v255_v19, %v249_v14  ;;  %v208_v25 = vsel %vm204_vm3, %v203_v15, %v197_v18 }
  0x8b   :  { %v269_v24 = vmul.f32 %v1118_v17, %v260_v22  ;;  %v217_v28 = vmul.f32 %v1130_v26, %v208_v25 }
  0x8d   :  { %381 = vmatpush.msra.mxu3 %v269_v24 }
  0x8f   :  { %382 = vmatpush.msra.mxu3 %v243_v27 }
  0x91   :  { %v1137_v30 = vpop.permute.xlu0 %170  ;;  %v201_v31 = vpop.permute.xlu1 %200  ;;  %383 = vmatpush.msra.mxu3 %v217_v28 }
  0x92   :  { %v182_v32 = vsel %vm178_vm4, %v177_v21, %v1137_v30  ;;  %v1143_v34 = vpop.permute.xlu2 %142  ;;  %v205_v42 = vsel %vm204_vm3, %v201_v31, %v203_v15 }
  0x93   :  { %v191_v33 = vmul.f32 %v1135_v29, %v182_v32  ;;  %v216_v48 = vmul.f32 %v1160_v43, %v205_v42  ;;  %v1232_v32 = vld [vmem:[#allocation3 + $0xa0] sm:$0xff] }
  0x95   :  { %384 = vmatpush.msra.mxu3 %v191_v33  ;;  %v1234_v33 = vld [vmem:[#allocation3 + $0xa8] sm:$0xff] }
  0x97   :  { %954 = vmatpush.msk.msra.mxu3 %vm54_vm0, %v1074_v5 }
  0x99   :  { %v1149_v36 = vpop.permute.xlu1 %174  ;;  %v253_v37 = vpop.permute.xlu0 %252 }
  0x9a   :  { %v257_v39 = vsel %vm256_vm2, %v253_v37, %v255_v19  ;;  %v179_v45 = vsel %vm178_vm4, %v1149_v36, %v177_v21  ;;  %v199_v46 = vpop.permute.xlu2 %198  ;;  %v1220_v19 = vld [vmem:[#allocation3 + $0x50] sm:$0xff] }
  0x9b   :  { %v268_v41 = vmul.f32 %v1147_v35, %v257_v39  ;;  %v190_v53 = vmul.f32 %v1166_v47, %v179_v45  ;;  %v206_v62 = vsel %vm204_vm3, %v199_v46, %v201_v31  ;;  %v207_v63 = vsel %vm204_vm3, %v197_v18, %v199_v46  ;;  %v1236_v39 = vld [vmem:[#allocation3 + $0x30] sm:$0xff] }
  0x9c   :  { %v214_v7 = vmul.f32 %v1192_v0, %v207_v63  ;;  %v215_v8 = vmul.f32 %v1194_v1, %v206_v62  ;;  %v1272_v62 = vld [vmem:[#allocation3 + $0x18] sm:$0xff] }
  0x9d   :  { %361 = vmatpush.msra.mxu2 %v268_v41 }
  0x9f   :  { %362 = vmatpush.msra.mxu2 %v242_v44 }
  0xa1   :  { %v225_v51 = vpop.permute.xlu1 %224  ;;  %363 = vmatpush.msra.mxu2 %v216_v48  ;;  %v251_v52 = vpop.permute.xlu0 %250 }
  0xa2   :  { %v232_v54 = vsel %vm230_vm1, %v225_v51, %v227_v10  ;;  %v233_v55 = vsel %vm230_vm1, %v223_v13, %v225_v51  ;;  %v259_v56 = vsel %vm256_vm2, %v249_v14, %v251_v52  ;;  %v258_v57 = vsel %vm256_vm2, %v251_v52, %v253_v37  ;;  %v1203_v9 = vpop.permute.xlu2 %120  ;;  %v1205_v10 = vld [vmem:[#allocation3 + $0x70] sm:$0xff] }
  0xa3   :  { %364 = vmatpush.msra.mxu2 %v190_v53  ;;  %v266_v60 = vmul.f32 %v1169_v49, %v259_v56  ;;  %v267_v61 = vmul.f32 %v1171_v50, %v258_v57  ;;  %v240_v4 = vmul.f32 %v1182_v58, %v233_v55  ;;  %v241_v5 = vmul.f32 %v1184_v59, %v232_v54 }
  0xa5   :  { %321 = vmatpush.msra.mxu0 %v266_v60  ;;  %341 = vmatpush.msra.mxu1 %v267_v61  ;;  %v1268_v60 = vld [vmem:[#allocation3 + $0x60] sm:$0xff]  ;;  %v1270_v61 = vld [vmem:[#allocation3 + $0x68] sm:$0xff] }
  0xa6   :  { %953 = vmatpush.msk.msra.mxu2 %vm54_vm0, %v1076_v6 }
  0xa7   :  { %322 = vmatpush.msra.mxu0 %v240_v4  ;;  %342 = vmatpush.msra.mxu1 %v241_v5 }
  0xa9   :  { %v1209_v12 = vpop.permute.xlu1 %146  ;;  %323 = vmatpush.msra.mxu0 %v214_v7  ;;  %343 = vmatpush.msra.mxu1 %v215_v8  ;;  %v145_v13 = vpop.permute.xlu0 %144 }
  0xaa   :  { %v149_v6 = vsel %vm148_vm5, %v145_v13, %v1209_v12  ;;  %v150_v14 = vsel %vm148_vm5, %v1143_v34, %v145_v13  ;;  %v93_v24 = vpop.permute.xlu2 %92 }
  0xab   :  { %v160_v15 = vmul.f32 %v1205_v10, %v150_v14  ;;  %v161_v18 = vmul.f32 %v1207_v11, %v149_v6  ;;  %v1287_v14 = vld [vmem:[#allocation3 + $0x40] sm:$0xff] }
  0xad   :  { %366 = vmatpush.msra.mxu2 %v160_v15  ;;  %386 = vmatpush.msra.mxu3 %v161_v18  ;;  %v1289_v15 = vld [vmem:[#allocation3 + $0x48] sm:$0xff] }
  0xb1   :  { %v119_v21 = vpop.permute.xlu1 %118  ;;  %v117_v22 = vpop.permute.xlu0 %116 }
  0xb2   :  { %v123_v25 = vsel %vm122_vm6, %v119_v21, %v1203_v9  ;;  %v124_v27 = vsel %vm122_vm6, %v117_v22, %v119_v21  ;;  %v66_v48 = vpop.permute.xlu2 %65 }
  0xb3   :  { %v134_v28 = vmul.f32 %v1220_v19, %v124_v27  ;;  %v135_v31 = vmul.f32 %v1222_v20, %v123_v25 }
  0xb5   :  { %367 = vmatpush.msra.mxu2 %v134_v28  ;;  %387 = vmatpush.msra.mxu3 %v135_v31 }
  0xb9   :  { %v91_v37 = vpop.permute.xlu1 %90  ;;  %v173_v38 = vpop.permute.xlu0 %172 }
  0xba   :  { %v98_v41 = vsel %vm96_vm7, %v91_v37, %v93_v24  ;;  %v180_v42 = vsel %vm178_vm4, %v173_v38, %v1149_v36  ;;  %v181_v44 = vsel %vm178_vm4, %v1137_v30, %v173_v38  ;;  %v1254_v36 = vld [vmem:[#allocation3 + $0x38] sm:$0xff]  ;;  %v1256_v30 = vld [vmem:[#allocation3 + $0x10] sm:$0xff] }
  0xbb   :  { %v188_v45 = vmul.f32 %v1232_v32, %v181_v44  ;;  %v189_v46 = vmul.f32 %v1234_v33, %v180_v42  ;;  %v108_v51 = vmul.f32 %v1236_v39, %v98_v41  ;;  %v1309_v42 = vld [vmem:[#allocation3] sm:$0xff]  ;;  %v1311_v44 = vld [vmem:[#allocation3 + $0x8] sm:$0xff] }
  0xbd   :  { %324 = vmatpush.msra.mxu0 %v188_v45  ;;  %344 = vmatpush.msra.mxu1 %v189_v46 }
  0xbe   :  { %368 = vmatpush.msra.mxu2 %v108_v51 }
  0xbf   :  { %951 = vmatpush.msk.msra.mxu0 %vm54_vm0, %v1066_v2  ;;  %952 = vmatpush.msk.msra.mxu1 %vm54_vm0, %v1068_v3  ;;  %v59_v2 = vld [vmem:[%s1590_s2] sm:$0xff]  ;;  %v115_v3 = vpop.permute.xlu2 %114 }
  0xc0   :  { %v125_v63 = vsel %vm122_vm6, %v115_v3, %v117_v22  ;;  %v126_v7 = vsel %vm122_vm6, %v1203_v9, %v115_v3 }
  0xc1   :  { %v64_v52 = vpop.permute.xlu1 %63  ;;  %v95_v53 = vpop.permute.xlu0 %94  ;;  %v133_v22 = vmul.f32 %v1289_v15, %v125_v63 }
  0xc2   :  { %v73_v54 = vsel %vm71_vm8, %v64_v52, %v66_v48  ;;  %v97_v55 = vsel %vm96_vm7, %v93_v24, %v95_v53  ;;  %v1298_v24 = vld [vmem:[#allocation3 + $0x28] sm:$0xff] }
  0xc3   :  { %v109_v56 = vmul.f32 %v1254_v36, %v97_v55  ;;  %v82_v57 = vmul.f32 %v1256_v30, %v73_v54 }
  0xc5   :  { %388 = vmatpush.msra.mxu3 %v109_v56  ;;  %369 = vmatpush.msra.mxu2 %v82_v57 }
  0xc6   :  { %944 = vmatmul.msk.f32.vlgmr.msra.gmra.mxu2 %vm310_vm9, %v59_v2 }
  0xc9   :  { %v141_v4 = vpop.permute.xlu1 %140  ;;  %v68_v5 = vpop.permute.xlu0 %67 }
  0xca   :  { %v151_v8 = vsel %vm148_vm5, %v141_v4, %v1143_v34  ;;  %v152_v13 = vsel %vm148_vm5, %v1209_v12, %v141_v4  ;;  %v72_v6 = vsel %vm71_vm8, %v66_v48, %v68_v5  ;;  %v132_v34 = vmul.f32 %v1287_v14, %v126_v7  ;;  %v1296_v12 = vld [vmem:[#allocation3 + $0x20] sm:$0xff] }
  0xcb   :  { %v158_v18 = vmul.f32 %v1268_v60, %v152_v13  ;;  %v159_v21 = vmul.f32 %v1270_v61, %v151_v8  ;;  %v83_v9 = vmul.f32 %v1272_v62, %v72_v6  ;;  %v1020_v7 = vmov 0  }
  0xcc   :  { %968 = vset.pattern.permute.xlu1 %v1020_v7  ;;  %969 = vset.pattern.permute.xlu0 %v1020_v7 }
  0xcd   :  { %326 = vmatpush.msra.mxu0 %v158_v18  ;;  %346 = vmatpush.msra.mxu1 %v159_v21 }
  0xce   :  { %389 = vmatpush.msra.mxu3 %v83_v9 }
  0xcf   :  { %327 = vmatpush.msra.mxu0 %v132_v34  ;;  %347 = vmatpush.msra.mxu1 %v133_v22 }
  0xd0   :  { %945 = vmatmul.msk.f32.vlgmr.msra.gmra.mxu3 %vm310_vm9, %v59_v2 }
  0xd1   :  { %v62_v25 = vpop.permute.xlu1 %61  ;;  %v89_v27 = vpop.permute.xlu0 %88 }
  0xd2   :  { %v74_v28 = vsel %vm71_vm8, %v62_v25, %v64_v52  ;;  %v75_v31 = vsel %vm71_vm8, %v68_v5, %v62_v25  ;;  %v99_v38 = vsel %vm96_vm7, %v89_v27, %v91_v37  ;;  %v100_v41 = vsel %vm96_vm7, %v95_v53, %v89_v27 }
  0xd3   :  { %v106_v45 = vmul.f32 %v1296_v12, %v100_v41  ;;  %v107_v46 = vmul.f32 %v1298_v24, %v99_v38  ;;  %v80_v48 = vmul.f32 %v1309_v42, %v75_v31  ;;  %v81_v51 = vmul.f32 %v1311_v44, %v74_v28 }
  0xd5   :  { %328 = vmatpush.msra.mxu0 %v106_v45  ;;  %348 = vmatpush.msra.mxu1 %v107_v46 }
  0xd7   :  { %329 = vmatpush.msra.mxu0 %v80_v48  ;;  %349 = vmatpush.msra.mxu1 %v81_v51 }
  0xd8   :  { %942 = vmatmul.msk.f32.vlgmr.msra.gmra.mxu0 %vm310_vm9, %v59_v2  ;;  %943 = vmatmul.msk.f32.vlgmr.msra.gmra.mxu1 %vm310_vm9, %v59_v2 }
 0x149   :  { %v1319_v37 = vpop.f32.mrf.mxu2 }
 0x14a   :  { %v442_v63 = vmul.f32 %v1319_v37, %v1319_v37 }
 0x153   :  { %v1321_v52 = vpop.f32.mrf.mxu3 }
 0x154   :  { %v444_v53 = vadd.f32 %v1321_v52, %v1319_v37  ;;  %v443_v4 = vmul.f32 %v1321_v52, %v1321_v52 }
 0x155   :  { %v1325_v54 = vpop.f32.mrf.mxu0  ;;  %v1327_v55 = vpop.f32.mrf.mxu1 }
 0x156   :  { %v396_v56 = vadd.f32 %v1327_v55, %v1325_v54  ;;  %v394_v57 = vmul.f32 %v1325_v54, %v1325_v54  ;;  %v395_v2 = vmul.f32 %v1327_v55, %v1327_v55  ;;  %445 = vadd.xlane.f32.xlu0 %v444_v53  ;;  %v447_v5 = vadd.f32 %v443_v4, %v442_v63 }
 0x158   :  { %397 = vadd.xlane.f32.xlu2 %v396_v56  ;;  %v399_v3 = vadd.f32 %v395_v2, %v394_v57 }
 0x15a   :  { %400 = vadd.xlane.f32.xlu1 %v399_v3  ;;  %v60_v3 = vld [vmem:[%s1591_s3] sm:$0xff] }
 0x160   :  { %448 = vadd.xlane.f32.xlu2 %v447_v5 }
 0x1c9   :  { %v446_v13 = vpop.xlane.xlu0 %445 }
 0x1ca   :  { %v450_v34 = vmul.f32 0.00390625, %v446_v13 }
 0x1cb   :  { %v398_v8 = vpop.xlane.xlu2 %397 }
 0x1cc   :  { %v402_v6 = vmul.f32 0.00390625, %v398_v8  ;;  %v452_v27 = vmul.f32 %v450_v34, %v450_v34 }
 0x1cd   :  { %v401_v18 = vpop.xlane.xlu1 %400 }
 0x1ce   :  { %v404_v21 = vmul.f32 %v402_v6, %v402_v6  ;;  %v403_v9 = vmul.f32 0.00390625, %v401_v18 }
 0x1d0   :  { %v405_v22 = vsub.f32 %v403_v9, %v404_v21 }
 0x1d2   :  { %v406_v25 = vadd.f32 1e-05, %v405_v22 }
 0x1d3   :  { %v449_v28 = vpop.xlane.xlu2 %448 }
 0x1d4   :  { %975 = vrsqrt.f32 %v406_v25  ;;  %v451_v31 = vmul.f32 0.00390625, %v449_v28  ;;  %vm413_vm11 = vweird.f32 %v406_v25 }
 0x1d6   :  { %v453_v38 = vsub.f32 %v451_v31, %v452_v27  ;;  %v1021_v27 = vmov 1  }
 0x1d7   :  { %970 = vset.pattern.permute.xlu2 %v1021_v27 }
 0x1d8   :  { %v454_v41 = vadd.f32 1e-05, %v453_v38 }
 0x1da   :  { %v976_v45 = vpop.eup %975  ;;  %977 = vrsqrt.f32 %v454_v41  ;;  %vm461_vm14 = vweird.f32 %v454_v41 }
 0x1db   :  { %v408_v46 = vmul.f32 %v976_v45, %v406_v25  ;;  %vm414_vm10 = vweird.f32 %v976_v45 }
 0x1dc   :  { %vm415_vm12 = vmor %vm413_vm11, %vm414_vm10 }
 0x1dd   :  { %v409_v48 = vmul.f32 %v976_v45, %v408_v46 }
 0x1df   :  { %v410_v51 = vmul.f32 0.5, %v409_v48 }
 0x1e0   :  { %v978_v53 = vpop.eup %977 }
 0x1e1   :  { %v411_v56 = vsub.f32 1.5, %v410_v51  ;;  %v456_v57 = vmul.f32 %v978_v53, %v454_v41  ;;  %vm462_vm13 = vweird.f32 %v978_v53 }
 0x1e2   :  { %vm463_vm15 = vmor %vm461_vm14, %vm462_vm13 }
 0x1e3   :  { %v457_v2 = vmul.f32 %v978_v53, %v456_v57  ;;  %v412_v63 = vmul.f32 %v976_v45, %v411_v56 }
 0x1e5   :  { %v458_v4 = vmul.f32 0.5, %v457_v2  ;;  %v416_v5 = vsel %vm415_vm12, %v976_v45, %v412_v63 }
 0x1e6   :  { %v417_v8 = vmul.f32 %v416_v5, %v60_v3 }
 0x1e7   :  { %v459_v13 = vsub.f32 1.5, %v458_v4 }
 0x1e8   :  { %426 = vperm.xlu1 %968, %v417_v8   ;;  %v418_v18 = vmul.f32 %v417_v8, %v402_v6 }
 0x1e9   :  { %v460_v21 = vmul.f32 %v978_v53, %v459_v13 }
 0x1ea   :  { %420 = vrot.lane.b32.xlu2 %v418_v18, %s1016_s10 }
 0x1eb   :  { %v464_v9 = vsel %vm463_vm15, %v978_v53, %v460_v21 }
 0x1ec   :  { %v465_v22 = vmul.f32 %v464_v9, %v60_v3 }
 0x1ee   :  { %v466_v25 = vmul.f32 %v465_v22, %v450_v34 }
 0x1f0   :  { %468 = vrot.lane.b32.xlu0 %v466_v25, %s1016_s10  ;;  %971 = vset.pattern.permute.xlu1 %v1021_v27 }
 0x1f8   :  { %474 = vperm.xlu0 %969, %v465_v22  }
 0x200   :  { %974 = vset.pattern.permute.xlu0 %v1021_v27 }
 0x244   :  { %v421_v28 = vpop.permute.xlu2 %420 }
 0x245   :  { %v423_v6 = vsub.f32 %v60_v3, %v421_v28 }
 0x247   :  { %433 = vperm.xlu2 %970, %v423_v6  }
 0x25a   :  { %v427_v41 = vpop.permute.xlu1 %426 }
 0x25b   :  { %v429_v34 = vmul.f32 %v427_v41, %v1325_v54  ;;  %v430_v45 = vmul.f32 %v427_v41, %v1327_v55 }
 0x262   :  { %v469_v31 = vpop.permute.xlu0 %468 }
 0x263   :  { %v471_v38 = vsub.f32 %v60_v3, %v469_v31 }
 0x265   :  { %481 = vperm.xlu1 %971, %v471_v38  }
 0x26a   :  { %v475_v54 = vpop.permute.xlu0 %474 }
 0x26b   :  { %v477_v55 = vmul.f32 %v475_v54, %v1319_v37 }
 0x26d   :  { %972 = vset.pattern.permute.xlu1 %v1020_v7  ;;  %v478_v7 = vmul.f32 %v475_v54, %v1321_v52 }
 0x2a1   :  { %v434_v46 = vpop.permute.xlu2 %433 }
 0x2a2   :  { %v436_v48 = vadd.f32 %v434_v46, %v429_v34  ;;  %v437_v51 = vadd.f32 %v434_v46, %v430_v45 }
 0x2a4   :  { %v438_v53 = vmul.f32 0.1, %v436_v48  ;;  %v439_v56 = vmul.f32 0.1, %v437_v51 }
 0x2a6   :  { %v1349_v57 = vmax.f32 %v436_v48, %v438_v53  ;;  %v1351_v2 = vmax.f32 %v437_v51, %v439_v56 }
 0x2a8   :  { %664 = vrot.lane.b32.xlu2 %v1349_v57, %s1013_s8  ;;  %566 = vrot.lane.b32.xlu0 %v1351_v2, %s1016_s10 }
 0x2a9   :  { %642 = vrot.lane.b32.xlu1 %v1351_v2, %s1012_s1 }
 0x2b0   :  { %640 = vrot.lane.b32.xlu2 %v1349_v57, %s1012_s1  ;;  %618 = vrot.lane.b32.xlu0 %v1351_v2, %s1014_s0 }
 0x2b1   :  { %518 = vrot.lane.b32.xlu1 %v1351_v2, %s1018_s12 }
 0x2b8   :  { %616 = vrot.lane.b32.xlu2 %v1349_v57, %s1014_s0 }
 0x2b9   :  { %494 = vrot.lane.b32.xlu1 %v1351_v2, %s1019_s13 }
 0x2c0   :  { %592 = vrot.lane.b32.xlu2 %v1349_v57, %s1015_s9 }
 0x2c8   :  { %666 = vrot.lane.b32.xlu2 %v1351_v2, %s1013_s8 }
 0x2d0   :  { %542 = vrot.lane.b32.xlu2 %v1351_v2, %s1017_s11 }
 0x2d7   :  { %v482_v3 = vpop.permute.xlu1 %481 }
 0x2d8   :  { %v484_v63 = vadd.f32 %v482_v3, %v477_v55  ;;  %v485_v4 = vadd.f32 %v482_v3, %v478_v7  ;;  %594 = vrot.lane.b32.xlu2 %v1351_v2, %s1015_s9 }
 0x2da   :  { %v486_v5 = vmul.f32 0.1, %v484_v63  ;;  %v487_v8 = vmul.f32 0.1, %v485_v4 }
 0x2dc   :  { %v1379_v13 = vmax.f32 %v484_v63, %v486_v5  ;;  %v1381_v18 = vmax.f32 %v485_v4, %v487_v8 }
 0x2de   :  { %670 = vrot.lane.b32.xlu0 %v1381_v18, %s1013_s8  ;;  %668 = vrot.lane.b32.xlu1 %v1379_v13, %s1013_s8 }
 0x2e0   :  { %568 = vrot.lane.b32.xlu2 %v1379_v13, %s1016_s10 }
 0x2e6   :  { %646 = vrot.lane.b32.xlu0 %v1381_v18, %s1012_s1  ;;  %644 = vrot.lane.b32.xlu1 %v1379_v13, %s1012_s1 }
 0x2e8   :  { %522 = vrot.lane.b32.xlu2 %v1381_v18, %s1018_s12 }
 0x2ee   :  { %622 = vrot.lane.b32.xlu0 %v1381_v18, %s1014_s0  ;;  %620 = vrot.lane.b32.xlu1 %v1379_v13, %s1014_s0 }
 0x2f0   :  { %498 = vrot.lane.b32.xlu2 %v1381_v18, %s1019_s13 }
 0x2f6   :  { %598 = vrot.lane.b32.xlu0 %v1381_v18, %s1015_s9  ;;  %596 = vrot.lane.b32.xlu1 %v1379_v13, %s1015_s9 }
 0x2f8   :  { %516 = vrot.lane.b32.xlu2 %v1349_v57, %s1018_s12 }
 0x2fe   :  { %546 = vrot.lane.b32.xlu0 %v1381_v18, %s1017_s11  ;;  %570 = vrot.lane.b32.xlu1 %v1381_v18, %s1016_s10 }
 0x302   :  { %v665_v37 = vpop.permute.xlu2 %664 }
 0x306   :  { %520 = vrot.lane.b32.xlu0 %v1379_v13, %s1018_s12  ;;  %544 = vrot.lane.b32.xlu1 %v1379_v13, %s1017_s11 }
 0x30a   :  { %v641_v52 = vpop.permute.xlu2 %640 }
 0x30e   :  { %496 = vrot.lane.b32.xlu0 %v1379_v13, %s1019_s13  ;;  %564 = vrot.lane.b32.xlu1 %v1349_v57, %s1016_s10 }
 0x312   :  { %v617_v21 = vpop.permute.xlu2 %616 }
 0x316   :  { %540 = vrot.lane.b32.xlu0 %v1349_v57, %s1017_s11  ;;  %492 = vrot.lane.b32.xlu1 %v1349_v57, %s1019_s13 }
 0x31a   :  { %v593_v9 = vpop.permute.xlu2 %592  ;;  %v1423_v22 = vpop.permute.xlu0 %566 }
 0x31b   :  { %v643_v25 = vpop.permute.xlu1 %642 }
 0x31c   :  { %v650_v31 = vsel %vm230_vm1, %v641_v52, %v643_v25 }
 0x31d   :  { %v656_v45 = vmul.f32 %v650_v31, %v1182_v58 }
 0x322   :  { %v667_v28 = vpop.permute.xlu2 %666  ;;  %v619_v6 = vpop.permute.xlu0 %618 }
 0x323   :  { %v674_v38 = vsel %vm256_vm2, %v665_v37, %v667_v28  ;;  %v626_v34 = vsel %vm204_vm3, %v617_v21, %v619_v6 }
 0x324   :  { %v680_v41 = vmul.f32 %v674_v38, %v1169_v49  ;;  %v632_v46 = vmul.f32 %v626_v34, %v1192_v0  ;;  %v1440_v49 = vpop.permute.xlu1 %518 }
 0x326   :  { %734 = vmatpush.msrb.mxu0 %v680_v41 }
 0x328   :  { %735 = vmatpush.msrb.mxu0 %v656_v45 }
 0x32a   :  { %v1434_v48 = vpop.permute.xlu2 %542  ;;  %736 = vmatpush.msrb.mxu0 %v632_v46 }
 0x32c   :  { %v1442_v54 = vpop.permute.xlu1 %494 }
 0x332   :  { %v595_v51 = vpop.permute.xlu2 %594 }
 0x333   :  { %v602_v53 = vsel %vm178_vm4, %v593_v9, %v595_v51 }
 0x334   :  { %v608_v56 = vmul.f32 %v602_v53, %v1232_v32 }
 0x336   :  { %737 = vmatpush.msrb.mxu0 %v608_v56 }
 0x338   :  { %738 = vmatpush.msrb.mxu0 %v1349_v57 }
 0x33a   :  { %v569_v34 = vpop.permute.xlu2 %568 }
 0x33b   :  { %v573_v56 = vsel %vm148_vm5, %v1423_v22, %v569_v34 }
 0x350   :  { %v669_v58 = vpop.permute.xlu1 %668  ;;  %v671_v55 = vpop.permute.xlu0 %670 }
 0x351   :  { %v673_v0 = vsel %vm256_vm2, %v667_v28, %v669_v58  ;;  %v672_v7 = vsel %vm256_vm2, %v669_v58, %v671_v55  ;;  %v675_v3 = vsel %vm256_vm2, %v671_v55, %v665_v37 }
 0x352   :  { %v681_v32 = vmul.f32 %v673_v0, %v1171_v50  ;;  %v682_v63 = vmul.f32 %v672_v7, %v1147_v35  ;;  %v683_v57 = vmul.f32 %v675_v3, %v1118_v17 }
 0x354   :  { %754 = vmatpush.msrb.mxu1 %v681_v32  ;;  %774 = vmatpush.msrb.mxu2 %v682_v63 }
 0x355   :  { %794 = vmatpush.msrb.mxu3 %v683_v57 }
 0x358   :  { %v645_v4 = vpop.permute.xlu1 %644  ;;  %v647_v5 = vpop.permute.xlu0 %646 }
 0x359   :  { %v649_v8 = vsel %vm230_vm1, %v643_v25, %v645_v4  ;;  %v648_v28 = vsel %vm230_vm1, %v645_v4, %v647_v5  ;;  %v651_v37 = vsel %vm230_vm1, %v647_v5, %v641_v52 }
 0x35a   :  { %v657_v50 = vmul.f32 %v649_v8, %v1184_v59  ;;  %v658_v35 = vmul.f32 %v648_v28, %v1155_v40  ;;  %v659_v17 = vmul.f32 %v651_v37, %v1125_v23 }
 0x35c   :  { %755 = vmatpush.msrb.mxu1 %v657_v50  ;;  %775 = vmatpush.msrb.mxu2 %v658_v35 }
 0x35d   :  { %795 = vmatpush.msrb.mxu3 %v659_v17 }
 0x360   :  { %v621_v31 = vpop.permute.xlu1 %620  ;;  %v623_v38 = vpop.permute.xlu0 %622 }
 0x361   :  { %v625_v25 = vsel %vm204_vm3, %v619_v6, %v621_v31  ;;  %v624_v41 = vsel %vm204_vm3, %v621_v31, %v623_v38  ;;  %v627_v52 = vsel %vm204_vm3, %v623_v38, %v617_v21 }
 0x362   :  { %v633_v59 = vmul.f32 %v625_v25, %v1194_v1  ;;  %v634_v40 = vmul.f32 %v624_v41, %v1160_v43  ;;  %v635_v23 = vmul.f32 %v627_v52, %v1130_v26 }
 0x364   :  { %756 = vmatpush.msrb.mxu1 %v633_v59  ;;  %776 = vmatpush.msrb.mxu2 %v634_v40 }
 0x365   :  { %796 = vmatpush.msrb.mxu3 %v635_v23 }
 0x368   :  { %v597_v45 = vpop.permute.xlu1 %596  ;;  %v599_v46 = vpop.permute.xlu0 %598 }
 0x369   :  { %v601_v6 = vsel %vm178_vm4, %v595_v51, %v597_v45  ;;  %v600_v53 = vsel %vm178_vm4, %v597_v45, %v599_v46  ;;  %v603_v21 = vsel %vm178_vm4, %v599_v46, %v593_v9  ;;  %v582_v51 = vmul.f32 %v573_v56, %v1205_v10  ;;  %v523_v9 = vpop.permute.xlu2 %522 }
 0x36a   :  { %v609_v1 = vmul.f32 %v601_v6, %v1234_v33  ;;  %v610_v43 = vmul.f32 %v600_v53, %v1166_v47  ;;  %v611_v26 = vmul.f32 %v603_v21, %v1135_v29 }
 0x36c   :  { %757 = vmatpush.msrb.mxu1 %v609_v1  ;;  %777 = vmatpush.msrb.mxu2 %v610_v43 }
 0x36d   :  { %797 = vmatpush.msrb.mxu3 %v611_v26 }
 0x36e   :  { %758 = vmatpush.msrb.mxu1 %v1351_v2  ;;  %778 = vmatpush.msrb.mxu2 %v1379_v13 }
 0x36f   :  { %798 = vmatpush.msrb.mxu3 %v1381_v18 }
 0x370   :  { %v571_v33 = vpop.permute.xlu1 %570  ;;  %779 = vmatpush.msrb.mxu2 %v582_v51  ;;  %v547_v47 = vpop.permute.xlu0 %546 }
 0x371   :  { %v572_v29 = vsel %vm148_vm5, %v569_v34, %v571_v33  ;;  %v499_v3 = vpop.permute.xlu2 %498 }
 0x372   :  { %v583_v58 = vmul.f32 %v572_v29, %v1207_v11 }
 0x374   :  { %799 = vmatpush.msrb.mxu3 %v583_v58 }
 0x378   :  { %v545_v55 = vpop.permute.xlu1 %544  ;;  %v521_v0 = vpop.permute.xlu0 %520 }
 0x379   :  { %v548_v2 = vsel %vm122_vm6, %v545_v55, %v547_v47  ;;  %v549_v10 = vsel %vm122_vm6, %v1434_v48, %v545_v55  ;;  %v524_v13 = vsel %vm96_vm7, %v521_v0, %v523_v9  ;;  %v525_v18 = vsel %vm96_vm7, %v1440_v49, %v521_v0  ;;  %v517_v50 = vpop.permute.xlu2 %516 }
 0x37a   :  { %v558_v7 = vmul.f32 %v549_v10, %v1220_v19  ;;  %v559_v11 = vmul.f32 %v548_v2, %v1222_v20  ;;  %v534_v32 = vmul.f32 %v525_v18, %v1236_v39  ;;  %v535_v63 = vmul.f32 %v524_v13, %v1254_v36 }
 0x37c   :  { %780 = vmatpush.msrb.mxu2 %v558_v7  ;;  %800 = vmatpush.msrb.mxu3 %v559_v11 }
 0x37e   :  { %781 = vmatpush.msrb.mxu2 %v534_v32  ;;  %801 = vmatpush.msrb.mxu3 %v535_v63 }
 0x380   :  { %v565_v57 = vpop.permute.xlu1 %564  ;;  %v497_v4 = vpop.permute.xlu0 %496 }
 0x381   :  { %v574_v5 = vsel %vm148_vm5, %v565_v57, %v1423_v22  ;;  %v575_v19 = vsel %vm148_vm5, %v571_v33, %v565_v57  ;;  %v500_v20 = vsel %vm71_vm8, %v497_v4, %v499_v3  ;;  %v501_v39 = vsel %vm71_vm8, %v1442_v54, %v497_v4  ;;  %v490_v22 = vld [vmem:[%s1592_s4] sm:$0xf] }
 0x382   :  { %v580_v36 = vmul.f32 %v575_v19, %v1268_v60  ;;  %v581_v8 = vmul.f32 %v574_v5, %v1270_v61  ;;  %v510_v28 = vmul.f32 %v501_v39, %v1256_v30  ;;  %v511_v37 = vmul.f32 %v500_v20, %v1272_v62 }
 0x383   :  { %v526_v30 = vsel %vm96_vm7, %v517_v50, %v1440_v49  ;;  %v527_v61 = vsel %vm96_vm7, %v523_v9, %v517_v50 }
 0x384   :  { %739 = vmatpush.msrb.mxu0 %v580_v36  ;;  %759 = vmatpush.msrb.mxu1 %v581_v8  ;;  %v532_v41 = vmul.f32 %v527_v61, %v1296_v12  ;;  %v491_v8 = vld [vmem:[%s1593_s5] sm:$0xf] }
 0x385   :  { %782 = vmatpush.msrb.mxu2 %v510_v28  ;;  %802 = vmatpush.msrb.mxu3 %v511_v37 }
 0x386   :  { %948 = vmatmul.msk.f32.vlgmr.msrb.gmra.mxu2 %vm310_vm9, %v490_v22  ;;  %949 = vmatmul.msk.f32.vlgmr.msrb.gmra.mxu3 %vm310_vm9, %v490_v22 }
 0x388   :  { %v493_v60 = vpop.permute.xlu1 %492  ;;  %v541_v35 = vpop.permute.xlu0 %540 }
 0x389   :  { %v550_v62 = vsel %vm122_vm6, %v541_v35, %v1434_v48  ;;  %v551_v17 = vsel %vm122_vm6, %v547_v47, %v541_v35  ;;  %v502_v25 = vsel %vm71_vm8, %v493_v60, %v1442_v54  ;;  %v503_v49 = vsel %vm71_vm8, %v499_v3, %v493_v60 }
 0x38a   :  { %v556_v31 = vmul.f32 %v551_v17, %v1287_v14  ;;  %v557_v38 = vmul.f32 %v550_v62, %v1289_v15  ;;  %v533_v48 = vmul.f32 %v526_v30, %v1298_v24  ;;  %v508_v52 = vmul.f32 %v503_v49, %v1309_v42 }
 0x38b   :  { %v509_v14 = vmul.f32 %v502_v25, %v1311_v44 }
 0x38c   :  { %740 = vmatpush.msrb.mxu0 %v556_v31  ;;  %760 = vmatpush.msrb.mxu1 %v557_v38 }
 0x38e   :  { %741 = vmatpush.msrb.mxu0 %v532_v41  ;;  %761 = vmatpush.msrb.mxu1 %v533_v48 }
 0x390   :  { %742 = vmatpush.msrb.mxu0 %v508_v52  ;;  %762 = vmatpush.msrb.mxu1 %v509_v14 }
 0x391   :  { %946 = vmatmul.msk.f32.vlgmr.msrb.gmra.mxu0 %vm310_vm9, %v490_v22  ;;  %947 = vmatmul.msk.f32.vlgmr.msrb.gmra.mxu1 %vm310_vm9, %v490_v22 }
 0x409   :  { %v1546_v16 = vpop.f32.mrf.mxu2  ;;  %v1548_v15 = vpop.f32.mrf.mxu3 }
 0x40a   :  { %v865_v12 = vmul.f32 %v1546_v16, %v1546_v16  ;;  %v866_v24 = vmul.f32 %v1548_v15, %v1548_v15 }
 0x40c   :  { %v869_v54 = vrot.slane %v865_v12, 4  ;;  %v870_v42 = vrot.slane %v866_v24, 4 }
 0x40e   :  { %v873_v44 = vsel %vm54_vm0, %v1546_v16, %v869_v54  ;;  %v874_v59 = vsel %vm54_vm0, %v1548_v15, %v870_v42  ;;  %v1558_v40 = vpop.f32.mrf.mxu0  ;;  %v1560_v23 = vpop.f32.mrf.mxu1 }
 0x40f   :  { %v807_v34 = vmul.f32 %v1558_v40, %v1558_v40  ;;  %v808_v45 = vmul.f32 %v1560_v23, %v1560_v23  ;;  %v875_v46 = vadd.f32 %v874_v59, %v873_v44 }
 0x411   :  { %v811_v6 = vrot.slane %v807_v34, 4  ;;  %v812_v53 = vrot.slane %v808_v45, 4  ;;  %876 = vadd.xlane.f32.xlu2 %v875_v46 }
 0x413   :  { %v815_v21 = vsel %vm54_vm0, %v1558_v40, %v811_v6  ;;  %v816_v1 = vsel %vm54_vm0, %v1560_v23, %v812_v53 }
 0x414   :  { %v817_v43 = vadd.f32 %v816_v1, %v815_v21 }
 0x416   :  { %818 = vadd.xlane.f32.xlu0 %v817_v43 }
 0x484   :  { %v877_v26 = vpop.xlane.xlu2 %876 }
 0x485   :  { %v878_v56 = vmul.f32 0.00390625, %v877_v26 }
 0x487   :  { %v879_v51 = vmul.f32 %v878_v56, %v878_v56 }
 0x489   :  { %v881_v33 = vrot.slane %v879_v51, 4  ;;  %v819_v47 = vpop.xlane.xlu0 %818 }
 0x48a   :  { %v820_v29 = vmul.f32 0.00390625, %v819_v47 }
 0x48b   :  { %v883_v9 = vsub.f32 %v878_v56, %v881_v33 }
 0x48c   :  { %v821_v58 = vmul.f32 %v820_v29, %v820_v29 }
 0x48d   :  { %v884_v55 = vadd.f32 1e-05, %v883_v9 }
 0x48e   :  { %v823_v0 = vrot.slane %v821_v58, 4 }
 0x48f   :  { %979 = vrsqrt.f32 %v884_v55  ;;  %vm891_vm2 = vweird.f32 %v884_v55 }
 0x490   :  { %v825_v2 = vsub.f32 %v820_v29, %v823_v0 }
 0x492   :  { %v826_v10 = vadd.f32 1e-05, %v825_v2 }
 0x494   :  { %981 = vrsqrt.f32 %v826_v10  ;;  %vm833_vm4 = vweird.f32 %v826_v10 }
 0x495   :  { %v980_v13 = vpop.eup %979 }
 0x496   :  { %v886_v18 = vmul.f32 %v980_v13, %v884_v55  ;;  %vm892_vm3 = vweird.f32 %v980_v13 }
 0x497   :  { %vm893_vm6 = vmor %vm891_vm2, %vm892_vm3 }
 0x498   :  { %v887_v7 = vmul.f32 %v980_v13, %v886_v18 }
 0x49a   :  { %v982_v11 = vpop.eup %981  ;;  %v888_v3 = vmul.f32 0.5, %v887_v7 }
 0x49b   :  { %v828_v32 = vmul.f32 %v982_v11, %v826_v10  ;;  %vm834_vm1 = vweird.f32 %v982_v11 }
 0x49c   :  { %v889_v57 = vsub.f32 1.5, %v888_v3  ;;  %vm835_vm5 = vmor %vm833_vm4, %vm834_vm1 }
 0x49d   :  { %v829_v63 = vmul.f32 %v982_v11, %v828_v32 }
 0x49e   :  { %v890_v20 = vmul.f32 %v980_v13, %v889_v57 }
 0x49f   :  { %v830_v4 = vmul.f32 0.5, %v829_v63 }
 0x4a0   :  { %v894_v28 = vsel %vm893_vm6, %v980_v13, %v890_v20 }
 0x4a1   :  { %v831_v5 = vsub.f32 1.5, %v830_v4  ;;  %v896_v50 = vrot.slane %v894_v28, 4 }
 0x4a3   :  { %v832_v19 = vmul.f32 %v982_v11, %v831_v5  ;;  %v898_v60 = vmul.f32 %v896_v50, %v491_v8 }
 0x4a5   :  { %v836_v39 = vsel %vm835_vm5, %v982_v11, %v832_v19  ;;  %v899_v35 = vmul.f32 %v898_v60, %v878_v56 }
 0x4a6   :  { %v838_v36 = vrot.slane %v836_v39, 4 }
 0x4a8   :  { %v840_v37 = vmul.f32 %v838_v36, %v491_v8 }
 0x4aa   :  { %v841_v22 = vmul.f32 %v840_v37, %v820_v29 }
 0x4ac   :  { %843 = vrot.lane.b32.xlu1 %v841_v22, %s1016_s10 }
 0x4b4   :  { %901 = vrot.lane.b32.xlu1 %v899_v35, %s1016_s10 }
 0x4bc   :  { %849 = vperm.xlu1 %972, %v840_v37  }
 0x4c4   :  { %907 = vperm.xlu1 %972, %v898_v60  }
 0x4cc   :  { %973 = vset.pattern.permute.xlu1 %v1021_v27 }
 0x51e   :  { %v844_v30 = vpop.permute.xlu1 %843 }
 0x51f   :  { %v846_v61 = vsub.f32 %v491_v8, %v844_v30 }
 0x521   :  { %856 = vperm.xlu1 %973, %v846_v61  }
 0x526   :  { %v902_v62 = vpop.permute.xlu1 %901 }
 0x527   :  { %v904_v17 = vsub.f32 %v491_v8, %v902_v62 }
 0x529   :  { %914 = vperm.xlu0 %974, %v904_v17  }
 0x52e   :  { %v850_v31 = vpop.permute.xlu1 %849 }
 0x52f   :  { %v852_v25 = vmul.f32 %v850_v31, %v1558_v40  ;;  %v853_v49 = vmul.f32 %v850_v31, %v1560_v23 }
 0x536   :  { %v908_v38 = vpop.permute.xlu1 %907 }
 0x537   :  { %v910_v27 = vmul.f32 %v908_v38, %v1546_v16  ;;  %v911_v54 = vmul.f32 %v908_v38, %v1548_v15 }
 0x593   :  { %v857_v41 = vpop.permute.xlu1 %856 }
 0x594   :  { %v859_v48 = vadd.f32 %v857_v41, %v852_v25  ;;  %v860_v52 = vadd.f32 %v857_v41, %v853_v49 }
 0x596   :  { %v861_v14 = vmul.f32 0.1, %v859_v48  ;;  %v862_v12 = vmul.f32 0.1, %v860_v52 }
 0x598   :  { %v864_v24 = vmax.f32 %v860_v52, %v862_v12  ;;  %v863_v42 = vmax.f32 %v859_v48, %v861_v14 }
 0x59a   :  { %v925_v44 = vrot.slane %v864_v24, 4 }
 0x59b   :  { %v915_v59 = vpop.permute.xlu0 %914 }
 0x59c   :  { %v926_v34 = vsel %vm54_vm0, %v863_v42, %v925_v44  ;;  %v917_v45 = vadd.f32 %v915_v59, %v910_v27  ;;  %v918_v46 = vadd.f32 %v915_v59, %v911_v54 }
 0x59d   :  { %928 = vst [vmem:[%s1594_s6] sm:$0xff] %v926_v34 }
 0x59e   :  { %v919_v40 = vmul.f32 0.1, %v917_v45  ;;  %v920_v23 = vmul.f32 0.1, %v918_v46 }
 0x5a0   :  { %v922_v6 = vmax.f32 %v918_v46, %v920_v23  ;;  %v921_v53 = vmax.f32 %v917_v45, %v919_v40 }
 0x5a2   :  { %v931_v21 = vrot.slane %v922_v6, 4 }
 0x5a4   :  { %v932_v16 = vsel %vm54_vm0, %v921_v53, %v931_v21 }
 0x5a5   :  { %950 = vst [vmem:[%s1594_s6 + $0x8] sm:$0xff] %v932_v16 }
 0x5a6   :  { %940 = vsyncpa [#allocation4], 1 }

</bundles_post_ra>
